<compile_context>
chip_gen: v6e
topology: v6e:2x2x1
jax: 0.10.0
libtpu: 0.0.40
codegen_flags: <defaults>
</compile_context>

<pallas_src>
import functools

import jax
import jax.numpy as jnp
from jax import lax
from jax.experimental import pallas as pl
from jax.experimental.pallas import tpu as pltpu


def _round_up(x, m):
    return (x + m - 1) // m * m


# --------------------------------------------------------------------------- #
# Shared conv body (operates on values already resident in VMEM)
# --------------------------------------------------------------------------- #
def _conv_body(xt, w_t, *, kh, kw, th, w_out):
    """xt: (>=th+kh-1, >=w_out+kw-1, C_in) f32, w_t: (Cp8, kh*kw*C_in) f32.

    Returns the conv output of this tile, channel-major: (Cp8, th*w_out) f32.
    Weight K ordering is (kh, kw, c_in) row-major (matches the wrapper).
    """
    c_in = xt.shape[-1]
    rows = th * w_out
    if c_in >= 128:
        # C_in already fills the MXU contraction depth: accumulate per tap.
        acc = jnp.zeros((w_t.shape[0], rows), jnp.float32)
        for ih in range(kh):
            for iw in range(kw):
                win = xt[ih:ih + th, iw:iw + w_out, :].reshape(rows, c_in)
                w_tap = w_t[:, (ih * kw + iw) * c_in:(ih * kw + iw + 1) * c_in]
                acc = acc + lax.dot_general(
                    w_tap, win, (((1,), (1,)), ((), ())),
                    preferred_element_type=jnp.float32)
        return acc
    # Small C_in: fold all kh*kw taps into one K = kh*kw*C_in contraction
    # (single MXU pass, single patch relayout instead of kh*kw of each).
    wins = []
    for ih in range(kh):
        for iw in range(kw):
            wins.append(xt[ih:ih + th, iw:iw + w_out, :])
    patch = jnp.concatenate(wins, axis=-1).reshape(rows, kh * kw * c_in)
    return lax.dot_general(w_t, patch, (((1,), (1,)), ((), ())),
                           preferred_element_type=jnp.float32)


def _fetch_halo_tile(x_hbm, x_vmem, sem, *, th, halo):
    """Manual double-buffered DMA of the haloed h-tile for grid step (nb, hb).

    Prefetches the next tile of the same batch element; the hb axis must be
    'arbitrary' so the per-core iteration over hb is sequential.
    """
    nb = pl.program_id(0)
    hb = pl.program_id(1)
    nh = pl.num_programs(1)
    slot = lax.rem(hb, 2)

    def copy(tile_idx, s):
        return pltpu.make_async_copy(
            x_hbm.at[nb, pl.ds(tile_idx * th, halo)], x_vmem.at[s], sem.at[s])

    @pl.when(hb == 0)
    def _():
        copy(0, 0).start()

    @pl.when(hb + 1 < nh)
    def _():
        copy(hb + 1, 1 - slot).start()

    copy(hb, slot).wait()
    return x_vmem[slot]


# --------------------------------------------------------------------------- #
# Kernels: one h-tile per image (auto-pipelined BlockSpec input)
# --------------------------------------------------------------------------- #
def _conv_relu_kernel(x_ref, w_ref, b_ref, o_ref, *, kh, kw, th, w_out):
    acc = _conv_body(x_ref[0], w_ref[...], kh=kh, kw=kw, th=th, w_out=w_out)
    o_ref[0] = jnp.maximum(acc + b_ref[...], 0.0).astype(o_ref.dtype)


def _conv_in_relu_kernel(x_ref, w_ref, g_ref, bt_ref, o_ref,
                         *, kh, kw, th, w_out, eps):
    acc = _conv_body(x_ref[0], w_ref[...], kh=kh, kw=kw, th=th, w_out=w_out)
    inv_n = 1.0 / float(th * w_out)
    mean = jnp.sum(acc, axis=1, keepdims=True) * inv_n                 # (Cp8, 1)
    var = jnp.maximum(jnp.sum(acc * acc, axis=1, keepdims=True) * inv_n
                      - mean * mean, 0.0)
    scale = lax.rsqrt(var + eps) * g_ref[...]
    shift = bt_ref[...] - mean * scale
    o_ref[0] = jnp.maximum(acc * scale + shift, 0.0).astype(o_ref.dtype)


# --------------------------------------------------------------------------- #
# Kernels: several h-tiles per image (manual haloed DMA from HBM)
# --------------------------------------------------------------------------- #
def _conv_relu_tiled_kernel(x_hbm, w_ref, b_ref, o_ref, x_vmem, sem,
                            *, kh, kw, th, w_out, halo):
    xt = _fetch_halo_tile(x_hbm, x_vmem, sem, th=th, halo=halo)
    acc = _conv_body(xt, w_ref[...], kh=kh, kw=kw, th=th, w_out=w_out)
    o_ref[0] = jnp.maximum(acc + b_ref[...], 0.0).astype(o_ref.dtype)


def _conv_stats_tiled_kernel(x_hbm, w_ref, stats_ref, x_vmem, sem,
                             *, kh, kw, th, w_out, halo):
    # Tiled InstanceNorm pass 1: per-(n, c) sum / sum-of-squares only; the conv
    # is recomputed in pass 2 instead of round-tripping an f32 intermediate.
    xt = _fetch_halo_tile(x_hbm, x_vmem, sem, th=th, halo=halo)
    acc = _conv_body(xt, w_ref[...], kh=kh, kw=kw, th=th, w_out=w_out)

    @pl.when(pl.program_id(1) == 0)
    def _():
        stats_ref[...] = jnp.zeros_like(stats_ref)

    s = jnp.sum(acc, axis=1, keepdims=True)                            # (Cp8, 1)
    s2 = jnp.sum(acc * acc, axis=1, keepdims=True)                     # (Cp8, 1)
    stats_ref[0] = stats_ref[0] + jnp.concatenate([s, s2], axis=1)     # (Cp8, 2)


def _conv_in_relu_tiled_kernel(x_hbm, w_ref, stats_ref, g_ref, bt_ref, o_ref,
                               x_vmem, sem,
                               *, kh, kw, th, w_out, halo, hw_total, eps):
    # Tiled InstanceNorm pass 2: recompute conv (memory-bound; MXU is free),
    # then normalize + affine + ReLU.
    xt = _fetch_halo_tile(x_hbm, x_vmem, sem, th=th, halo=halo)
    acc = _conv_body(xt, w_ref[...], kh=kh, kw=kw, th=th, w_out=w_out)
    stats = stats_ref[0]                                               # (Cp8, 2)
    inv_n = 1.0 / float(hw_total)
    mean = stats[:, 0:1] * inv_n
    var = jnp.maximum(stats[:, 1:2] * inv_n - mean * mean, 0.0)
    scale = lax.rsqrt(var + eps) * g_ref[...]
    shift = bt_ref[...] - mean * scale
    o_ref[0] = jnp.maximum(acc * scale + shift, 0.0).astype(o_ref.dtype)


# --------------------------------------------------------------------------- #
# Tile sizing (per-generation VMEM budget)
# --------------------------------------------------------------------------- #
def _vmem_working_set_bytes(th, w_out, wp, c_in, cp8, kh, kw):
    """Conservative per-grid-step VMEM estimate (f32, padded VMEM layouts)."""
    halo = th + kh - 1
    rows = th * w_out
    c_in_l = _round_up(c_in, 128)
    k_l = _round_up(kh * kw * c_in, 128)
    rows_l = _round_up(rows, 128)
    in_tile = halo * _round_up(wp, 8) * c_in_l * 4         # one haloed slot
    w_tile = _round_up(cp8, 8) * k_l * 4
    out_tile = cp8 * rows_l * 4
    if c_in >= 128:
        tmp = 2 * _round_up(rows, 8) * c_in_l * 4          # a couple of live windows
    else:
        tmp = (kh * kw * th * _round_up(w_out, 8) * c_in_l * 4   # shifted windows
               + _round_up(rows, 8) * k_l * 4)                   # folded patch
    acc_tmp = 2 * cp8 * rows_l * 4                         # accumulator + epilogue temp
    return 2 * in_tile + 2 * out_tile + 2 * w_tile + tmp + acc_tmp


def _choose_block_rows(h_out, w_out, wp, c_in, cp8, kh, kw, budget):
    """Largest h-tile dividing h_out whose output block is lane-aligned and whose
    working set fits the per-generation VMEM budget."""
    cands = [t for t in range(h_out, 0, -1)
             if h_out % t == 0 and (t == h_out or (t * w_out) % 128 == 0)]
    for t in cands:
        if _vmem_working_set_bytes(t, w_out, wp, c_in, cp8, kh, kw) <= budget:
            return t
    # TODO(synk): extreme W*C_in can exceed the budget even at the smallest legal
    # tile; a production version should additionally tile the width axis here.
    return cands[-1]


def _vmem_budget():
    try:
        cap = int(pltpu.get_tpu_info().vmem_capacity_bytes)
    except Exception:
        cap = 64 * 1024 * 1024            # conservative (v7x-sized) default
    budget = int(cap * 0.75)              # v5e/v6e ~96 MiB, v7x ~48 MiB
    limit = max(min(cap - 4 * 1024 * 1024, budget + 16 * 1024 * 1024),
                32 * 1024 * 1024)
    return budget, int(limit)


# --------------------------------------------------------------------------- #
# Wrapper
# --------------------------------------------------------------------------- #
def basic_conv(x, weight, bias, gamma, beta, *, use_bn, padding=1, eps=1e-5,
               block_rows=None):
    """BasicConv forward: Conv2d(stride=1) [+ InstanceNorm2d(affine)] + ReLU.

    x: (N, C_in, H, W) NCHW; weight: (C_out, C_in, KH, KW).  Returns NCHW f32.
    """
    # TODO(synk): only stride=1 / dilation=1 / groups=1 (the configuration
    # SAWaveNet's BasicConv uses) is implemented.
    n, c_in, h, w = x.shape
    c_out, _, kh, kw = weight.shape
    p = padding
    hp, wp = h + 2 * p, w + 2 * p
    h_out, w_out = hp - kh + 1, wp - kw + 1
    hw = h_out * w_out
    cp8 = max(_round_up(c_out, 8), 8)          # sublane-aligned channel count
    k_dim = kh * kw * c_in
    cdt = jnp.float32                          # see bf16 TODO at top of file

    # Layout prep in XLA (interface mandates NCHW): padded NHWC activations,
    # weight as (Cp8, kh*kw*C_in) with K ordered (kh, kw, c_in), per-channel
    # vectors as (Cp8, 1) columns to match the channel-major kernel layout.
    x_nhwc = jnp.transpose(x.astype(cdt), (0, 2, 3, 1))
    xpad = jnp.pad(x_nhwc, ((0, 0), (p, p), (p, p), (0, 0)))
    w2 = jnp.transpose(weight.astype(cdt), (2, 3, 1, 0)).reshape(k_dim, c_out)
    w_t = jnp.pad(w2, ((0, 0), (0, cp8 - c_out))).T                   # (Cp8, K)
    col = lambda v: jnp.pad(v.astype(jnp.float32).reshape(c_out, 1),
                            ((0, cp8 - c_out), (0, 0)))
    b_c, g_c, bt_c = col(bias), col(gamma), col(beta)

    budget, vmem_limit = _vmem_budget()
    if block_rows is not None:
        th = block_rows
        if h_out % th != 0 or (th != h_out and (th * w_out) % 128 != 0):
            raise ValueError("block_rows must divide h_out and give a 128-lane "
                             "aligned output tile")
    else:
        th = _choose_block_rows(h_out, w_out, wp, c_in, cp8, kh, kw, budget)
    nh = h_out // th
    halo = th + kh - 1
    rows = th * w_out

    out_shape = jax.ShapeDtypeStruct((n, cp8, hw), jnp.float32)

    if nh == 1:
        # Whole image fits one tile: auto-pipelined BlockSpecs, fully fused.
        # TODO(synk): when N == 1 on v7x, split the h axis across both
        # TensorCores instead of running a single-step grid.
        x_spec = pl.BlockSpec((1, hp, wp, c_in), lambda nb: (nb, 0, 0, 0))
        w_spec = pl.BlockSpec((cp8, k_dim), lambda nb: (0, 0))
        v_spec = pl.BlockSpec((cp8, 1), lambda nb: (0, 0))
        o_spec = pl.BlockSpec((1, cp8, hw), lambda nb: (nb, 0, 0))
        cparams = pltpu.CompilerParams(dimension_semantics=("parallel",),
                                       vmem_limit_bytes=vmem_limit)
        if not use_bn:
            out_flat = pl.pallas_call(
                functools.partial(_conv_relu_kernel, kh=kh, kw=kw, th=th,
                                  w_out=w_out),
                out_shape=out_shape,
                grid_spec=pltpu.PrefetchScalarGridSpec(
                    num_scalar_prefetch=0, grid=(n,),
                    in_specs=[x_spec, w_spec, v_spec], out_specs=o_spec),
                compiler_params=cparams,
            )(xpad, w_t, b_c)
        else:
            out_flat = pl.pallas_call(
                functools.partial(_conv_in_relu_kernel, kh=kh, kw=kw, th=th,
                                  w_out=w_out, eps=eps),
                out_shape=out_shape,
                grid_spec=pltpu.PrefetchScalarGridSpec(
                    num_scalar_prefetch=0, grid=(n,),
                    in_specs=[x_spec, w_spec, v_spec, v_spec], out_specs=o_spec),
                compiler_params=cparams,
            )(xpad, w_t, g_c, bt_c)
    else:
        # Tiled path: activation stays in HBM; haloed h-slices are DMA'd with a
        # 2-slot prefetch.  hb stays "arbitrary" (prefetch chain); the batch
        # axis carries megacore parallelism.
        x_any = pl.BlockSpec(memory_space=pl.ANY)
        w_spec = pl.BlockSpec((cp8, k_dim), lambda nb, hb: (0, 0))
        v_spec = pl.BlockSpec((cp8, 1), lambda nb, hb: (0, 0))
        o_spec = pl.BlockSpec((1, cp8, rows), lambda nb, hb: (nb, 0, hb))
        s_spec = pl.BlockSpec((1, cp8, 2), lambda nb, hb: (nb, 0, 0))
        scratch = [pltpu.VMEM((2, halo, wp, c_in), cdt),
                   pltpu.SemaphoreType.DMA((2,))]
        cparams = pltpu.CompilerParams(
            dimension_semantics=("parallel", "arbitrary"),
            vmem_limit_bytes=vmem_limit)
        if not use_bn:
            out_flat = pl.pallas_call(
                functools.partial(_conv_relu_tiled_kernel, kh=kh, kw=kw, th=th,
                                  w_out=w_out, halo=halo),
                out_shape=out_shape,
                grid_spec=pltpu.PrefetchScalarGridSpec(
                    num_scalar_prefetch=0, grid=(n, nh),
                    in_specs=[x_any, w_spec, v_spec], out_specs=o_spec,
                    scratch_shapes=scratch),
                compiler_params=cparams,
            )(xpad, w_t, b_c)
        else:
            # Pass 1: per-(n, c) sum / sumsq, accumulated across the h-tile axis.
            stats = pl.pallas_call(
                functools.partial(_conv_stats_tiled_kernel, kh=kh, kw=kw, th=th,
                                  w_out=w_out, halo=halo),
                out_shape=jax.ShapeDtypeStruct((n, cp8, 2), jnp.float32),
                grid_spec=pltpu.PrefetchScalarGridSpec(
                    num_scalar_prefetch=0, grid=(n, nh),
                    in_specs=[x_any, w_spec], out_specs=s_spec,
                    scratch_shapes=scratch),
                compiler_params=cparams,
            )(xpad, w_t)
            # Pass 2: recompute conv, normalize + affine + ReLU.
            out_flat = pl.pallas_call(
                functools.partial(_conv_in_relu_tiled_kernel, kh=kh, kw=kw,
                                  th=th, w_out=w_out, halo=halo, hw_total=hw,
                                  eps=eps),
                out_shape=out_shape,
                grid_spec=pltpu.PrefetchScalarGridSpec(
                    num_scalar_prefetch=0, grid=(n, nh),
                    in_specs=[x_any, w_spec, s_spec, v_spec, v_spec],
                    out_specs=o_spec, scratch_shapes=scratch),
                compiler_params=cparams,
            )(xpad, w_t, stats, g_c, bt_c)

    # NCHW-flat kernel output: reshape is free; the channel slice is a no-op
    # whenever c_out is already a multiple of 8.
    return out_flat.reshape(n, cp8, h_out, w_out)[:, :c_out]


# --------------------------------------------------------------------------- #
# Reference + self-test
# --------------------------------------------------------------------------- #
def _reference(x, weight, bias, gamma, beta, *, use_bn, padding=1, eps=1e-5):
    y = lax.conv_general_dilated(
        x.astype(jnp.float32), weight.astype(jnp.float32),
        window_strides=(1, 1), padding=[(padding, padding), (padding, padding)],
        dimension_numbers=("NCHW", "OIHW", "NCHW"))
    if use_bn:
        mean = jnp.mean(y, axis=(2, 3), keepdims=True)
        var = jnp.mean((y - mean) ** 2, axis=(2, 3), keepdims=True)
        y = (y - mean) * lax.rsqrt(var + eps)
        y = y * gamma.reshape(1, -1, 1, 1) + beta.reshape(1, -1, 1, 1)
    else:
        y = y + bias.reshape(1, -1, 1, 1)
    return jnp.maximum(y, 0.0)


if __name__ == "__main__":
    key = jax.random.PRNGKey(0)
    N, C_IN, C_OUT, H, W, K = 2, 4, 8, 16, 16, 3

    k1, k2, k3, k4, k5 = jax.random.split(key, 5)
    x = jax.random.normal(k1, (N, C_IN, H, W), dtype=jnp.float32)
    weight = 0.1 * jax.random.normal(k2, (C_OUT, C_IN, K, K), dtype=jnp.float32)
    conv_bias = 0.1 * jax.random.normal(k3, (C_OUT,), dtype=jnp.float32)
    gamma = jnp.ones((C_OUT,), jnp.float32) + 0.05 * jax.random.normal(k4, (C_OUT,))
    beta = 0.05 * jax.random.normal(k5, (C_OUT,), dtype=jnp.float32)
    zeros = jnp.zeros((C_OUT,), jnp.float32)
    ones = jnp.ones((C_OUT,), jnp.float32)

    ok = True
    # (a) use_bn=False, single-tile fused path: Conv2d(bias=True) -> ReLU.
    out_a = jax.block_until_ready(
        basic_conv(x, weight, conv_bias, ones, zeros, use_bn=False, padding=1))
    ref_a = _reference(x, weight, conv_bias, ones, zeros, use_bn=False, padding=1)
    ok &= bool(jnp.allclose(out_a, ref_a, atol=1e-4, rtol=1e-4))

    # (b) use_bn=True, single-tile fused conv + InstanceNorm + ReLU.
    out_b = jax.block_until_ready(
        basic_conv(x, weight, zeros, gamma, beta, use_bn=True, padding=1))
    ref_b = _reference(x, weight, zeros, gamma, beta, use_bn=True, padding=1)
    ok &= bool(jnp.allclose(out_b, ref_b, atol=1e-4, rtol=1e-4))

    # (c) use_bn=False with forced h-tiling: manual haloed-DMA (prefetch) path.
    out_c = jax.block_until_ready(
        basic_conv(x, weight, conv_bias, ones, zeros, use_bn=False, padding=1,
                   block_rows=8))
    ok &= bool(jnp.allclose(out_c, ref_a, atol=1e-4, rtol=1e-4))

    # (d) use_bn=True with forced h-tiling: stats pass + recompute/normalize pass.
    out_d = jax.block_until_ready(
        basic_conv(x, weight, zeros, gamma, beta, use_bn=True, padding=1,
                   block_rows=8))
    ok &= bool(jnp.allclose(out_d, ref_b, atol=1e-4, rtol=1e-4))

    print("KERNEL_OK" if ok else "KERNEL_MISMATCH")
</pallas_src>

<mosaic_0001>
module attributes {stable_mosaic.version = 11 : i64} {
  func.func @_conv_relu_kernel(%arg0: i32, %arg1: memref<1x18x18x4xf32, #tpu.memory_space<vmem>>, %arg2: memref<8x36xf32, #tpu.memory_space<vmem>>, %arg3: memref<8x1xf32, #tpu.memory_space<vmem>>, %arg4: memref<1x8x256xf32, #tpu.memory_space<vmem>>) attributes {dimension_semantics = [#tpu.dimension_semantics<parallel>], iteration_bounds = array<i64: 2>, scalar_prefetch = 0 : i64, scratch_operands = 0 : i64, tpu.core_type = #tpu.core_type<tc>, window_params = [{transform_indices = @transform_0, window_bounds = array<i64: 1, 18, 18, 4>}, {pipeline_mode = #tpu.pipeline_mode<synchronous>, transform_indices = @transform_1, window_bounds = array<i64: 8, 36>}, {pipeline_mode = #tpu.pipeline_mode<synchronous>, transform_indices = @transform_2, window_bounds = array<i64: 8, 1>}, {transform_indices = @transform_3, window_bounds = array<i64: 1, 8, 256>}]} {
    %c0 = arith.constant 0 : index
    %c0_0 = arith.constant 0 : index
    %c0_1 = arith.constant 0 : index
    %c0_2 = arith.constant 0 : index
    %0 = vector.load %arg1[%c0, %c0_0, %c0_1, %c0_2] : memref<1x18x18x4xf32, #tpu.memory_space<vmem>>, vector<1x18x18x4xf32>
    %1 = vector.shape_cast %0 : vector<1x18x18x4xf32> to vector<18x18x4xf32>
    %c0_3 = arith.constant 0 : index
    %c0_4 = arith.constant 0 : index
    %2 = vector.load %arg2[%c0_3, %c0_4] : memref<8x36xf32, #tpu.memory_space<vmem>>, vector<8x36xf32>
    %3 = vector.extract_strided_slice %1 {offsets = [0, 0, 0], sizes = [16, 16, 4], strides = [1, 1, 1]} : vector<18x18x4xf32> to vector<16x16x4xf32>
    %4 = vector.extract_strided_slice %1 {offsets = [0, 1, 0], sizes = [16, 16, 4], strides = [1, 1, 1]} : vector<18x18x4xf32> to vector<16x16x4xf32>
    %5 = vector.extract_strided_slice %1 {offsets = [0, 2, 0], sizes = [16, 16, 4], strides = [1, 1, 1]} : vector<18x18x4xf32> to vector<16x16x4xf32>
    %6 = vector.extract_strided_slice %1 {offsets = [1, 0, 0], sizes = [16, 16, 4], strides = [1, 1, 1]} : vector<18x18x4xf32> to vector<16x16x4xf32>
    %7 = vector.extract_strided_slice %1 {offsets = [1, 1, 0], sizes = [16, 16, 4], strides = [1, 1, 1]} : vector<18x18x4xf32> to vector<16x16x4xf32>
    %8 = vector.extract_strided_slice %1 {offsets = [1, 2, 0], sizes = [16, 16, 4], strides = [1, 1, 1]} : vector<18x18x4xf32> to vector<16x16x4xf32>
    %9 = vector.extract_strided_slice %1 {offsets = [2, 0, 0], sizes = [16, 16, 4], strides = [1, 1, 1]} : vector<18x18x4xf32> to vector<16x16x4xf32>
    %10 = vector.extract_strided_slice %1 {offsets = [2, 1, 0], sizes = [16, 16, 4], strides = [1, 1, 1]} : vector<18x18x4xf32> to vector<16x16x4xf32>
    %11 = vector.extract_strided_slice %1 {offsets = [2, 2, 0], sizes = [16, 16, 4], strides = [1, 1, 1]} : vector<18x18x4xf32> to vector<16x16x4xf32>
    %12 = tpu.concatenate %3, %4, %5, %6, %7, %8, %9, %10, %11 in 2 : vector<16x16x4xf32>, vector<16x16x4xf32>, vector<16x16x4xf32>, vector<16x16x4xf32>, vector<16x16x4xf32>, vector<16x16x4xf32>, vector<16x16x4xf32>, vector<16x16x4xf32>, vector<16x16x4xf32> -> vector<16x16x36xf32>
    %13 = vector.shape_cast %12 : vector<16x16x36xf32> to vector<256x36xf32>
    %cst = arith.constant dense<0.000000e+00> : vector<8x256xf32>
    %14 = tpu.matmul %2, %13, %cst {dimension_numbers = #tpu.dot_dimension_numbers<[1], [1], [0], [0], [0, 0, 1, 0], [], []>} : vector<8x36xf32>, vector<256x36xf32>, vector<8x256xf32> -> vector<8x256xf32>
    %c0_5 = arith.constant 0 : index
    %c0_6 = arith.constant 0 : index
    %15 = vector.load %arg3[%c0_5, %c0_6] : memref<8x1xf32, #tpu.memory_space<vmem>>, vector<8x1xf32>
    %16 = vector.broadcast %15 : vector<8x1xf32> to vector<8x256xf32>
    %17 = arith.addf %14, %16 : vector<8x256xf32>
    %cst_7 = arith.constant 0.000000e+00 : f32
    %18 = vector.broadcast %cst_7 : f32 to vector<8x256xf32>
    %19 = arith.maximumf %17, %18 : vector<8x256xf32>
    %c0_8 = arith.constant 0 : index
    %c0_9 = arith.constant 0 : index
    %c0_10 = arith.constant 0 : index
    %20 = vector.load %arg4[%c0_8, %c0_9, %c0_10] : memref<1x8x256xf32, #tpu.memory_space<vmem>>, vector<1x8x256xf32>
    %21 = vector.shape_cast %20 : vector<1x8x256xf32> to vector<8x256xf32>
    %22 = vector.shape_cast %19 : vector<8x256xf32> to vector<1x8x256xf32>
    tpu.vector_store %arg4[%c0_8, %c0_9, %c0_10], %22 {strides = array<i32>} : memref<1x8x256xf32, #tpu.memory_space<vmem>>, vector<1x8x256xf32>,
    return
  }
  func.func @transform_0(%arg0: i32) -> (i32, i32, i32, i32) {
    %c0_i32 = arith.constant 0 : i32
    %c0_i32_0 = arith.constant 0 : i32
    %c0_i32_1 = arith.constant 0 : i32
    %c0_i32_2 = arith.constant 0 : i32
    return %arg0, %c0_i32, %c0_i32_0, %c0_i32_1 : i32, i32, i32, i32
  }
  func.func @transform_1(%arg0: i32) -> (i32, i32) {
    %c0_i32 = arith.constant 0 : i32
    %c0_i32_0 = arith.constant 0 : i32
    %c0_i32_1 = arith.constant 0 : i32
    return %c0_i32, %c0_i32_0 : i32, i32
  }
  func.func @transform_2(%arg0: i32) -> (i32, i32) {
    %c0_i32 = arith.constant 0 : i32
    %c0_i32_0 = arith.constant 0 : i32
    %c0_i32_1 = arith.constant 0 : i32
    return %c0_i32, %c0_i32_0 : i32, i32
  }
  func.func @transform_3(%arg0: i32) -> (i32, i32, i32) {
    %c0_i32 = arith.constant 0 : i32
    %c0_i32_0 = arith.constant 0 : i32
    %c0_i32_1 = arith.constant 0 : i32
    return %arg0, %c0_i32, %c0_i32_0 : i32, i32, i32
  }
}

</mosaic_0001>

<bundles_post_ra>
// kernel: tpu_custom_call.1
= control target key start
LH: loop header
LB: loop body
LE: loop exit
PB: predicated region body
PF: predicated region fallthrough
CT: control target
= control target key end

     0   :  { %8 = vsyncpa [#allocation3], 0  ;;  %s3660_s0 = inlined_call_operand.vmem [shape: f32[2,18,18,4], index: 0, kind: input, shape index: {}]   ;;  %s3661_s1 = inlined_call_operand.vmem [shape: f32[8,36], index: 1, kind: input, shape index: {}]   ;;  %s3662_s2 = inlined_call_operand.vmem [shape: f32[8,1], index: 2, kind: input, shape index: {}]   ;;  %s3663_s3 = inlined_call_operand.hbm [shape: f32[2,8,256], index: 3, kind: output, shape index: {}]  }
   0x1   :  { %10 = vsyncpa [#allocation3 + $0x1], 0  ;;  %s1989_s12 = smov 0   ;;  %s1991_s13 = smov 0  }
   0x2   :  { %s1993_s14 = smov 0   ;;  %s1995_s15 = smov 0  }
   0x3 LB: > { %s2010_s16 = sadd.s32 4294967295, %s1957_s15   ;;  %s1747_s17 = sadd.s32 4294967294, %s1957_s15   ;;  %s1957_s15 = sphi %s1995_s15, %s3975_s15   ;;  %s1953_s14 = sphi %s1993_s14, %s3974_s14   ;;  %s1949_s13 = sphi %s1991_s13, %s3973_s13   ;;  %s1945_s12 = sphi %s1989_s12, %s3972_s12  }
   0x4   : > { %s2014_s18 = sadd.s32 1, %s1957_s15   ;;  %s91_s19 = sadd.s32 1, %s1953_s14 }
   0x5   : > { %s88_s20 = ssub.s32 %s1957_s15, %s2014_s18  ;;  %p101_p0 = scmp.ne.s32.totalorder %s1953_s14, %s1949_s13 }
   0x6   : > { %p89_p1 = scmp.eq.s32.totalorder %s88_s20, 0  ;;  %p102_p2 = scmp.eq.s32.totalorder %s2010_s16, 1 }
   0x7   : > { %p107_p3 = scmp.ne.s32.totalorder %s1949_s13, %s1945_s12  ;;  %p108_p4 = scmp.eq.s32.totalorder %s1747_s17, 1 }
   0x8   : > { %s2025_s21 = scalar_select %p89_p1, %s1953_s14, %s91_s19  }
   0x9   : > { %p2027_p5 = por %p102_p2, %p101_p0  ;;  %p2031_p6 = por %p108_p4, %p107_p3 }
   0xa   : > { %p1750_p7 = scmp.ge.s32.totalorder %s1957_s15, 1  ;;  %p140_p8 = scmp.lt.s32.totalorder %s1957_s15, 3 }
   0xc   : > { %p141_p9 = pnand %p1750_p7, %p140_p8 }
   0xe   : > { %144 = sbr.rel (%p141_p9) target bundleno = 871 (0x367), region = 32 }
  0x13   : > { %p164_p10 = scmp.lt.s32.totalorder %s2010_s16, 1  ;;  %vm272_vm0 = vcmask 1046528   ;;  %s1959_s29 = smov 4   ;;  %vm449_vm1 = vcmask 1045504   ;;  %vm1228_vm2 = vcmask 31744   ;;  %vm1261_vm3 = vcmask 64512  }
  0x14   : > { %s1960_s30 = smov 8   ;;  %s1961_s4 = smov 12   ;;  %vm1294_vm4 = vcmask 97280   ;;  %vm1327_vm5 = vcmask 130048   ;;  %vm1360_vm6 = vcmask 162816   ;;  %vm1393_vm7 = vcmask 195584  }
  0x15   : > { %s165_s24 = scalar_select %p164_p10, %s2010_s16, 1  ;;  %vm1426_vm8 = vcmask 228352   ;;  %vm1459_vm9 = vcmask 261120   ;;  %vm1498_vm10 = vcmask 293888  }
  0x16   : > { %s1962_s5 = smov 16   ;;  %s1963_s6 = smov 20  }
  0x17   : > { %s1826_s25 = smul.u32 432, %s165_s24  ;;  %s1964_s7 = smov 24  }
  0x18   : > { %s1965_s8 = smov 28   ;;  %s1966_s9 = smov 32  }
  0x19   : > { %s2042_s28 = scalar_lea.vmem %s3660_s0, %s1826_s25  ;;  %s161_s20 = sand.u32 1, %s1949_s13  }
  0x1a   : > { %v2045_v0 = vld [vmem:[%s2042_s28 + $0x18] sm:$0xff]  ;;  %v2048_v1 = vld [vmem:[%s2042_s28 + $0x20] sm:$0xff]  ;;  %v2056_v5 = vld [vmem:[%s2042_s28 + $0x8] sm:$0xff]  ;;  %s1751_s24 = sshll.u32 %s161_s20, 4  ;;  %s1791_s25 = sshll.u32 %s2010_s16, 8 }
  0x1b   : > { %v2051_v2 = vld [vmem:[%s2042_s28] sm:$0xff]  ;;  %v278_v3 = vrot.slane %v2045_v0, 1  ;;  %v279_v4 = vrot.slane %v2048_v1, 1  ;;  %v2060_v7 = vld [vmem:[%s2042_s28 + $0x28] sm:$0x3]  ;;  %v274_v8 = vrot.slane %v2056_v5, 1 }
  0x1c   : > { %v273_v6 = vrot.slane %v2051_v2, 1  ;;  %v281_v9 = vrot.slane %v2060_v7, 1  ;;  %v2065_v10 = vld [vmem:[%s2042_s28 + $0x10] sm:$0x3]  ;;  %v2068_v11 = vld [vmem:[%s2042_s28 + $0x38] sm:$0xff]  ;;  %v2098_v24 = vld [vmem:[%s2042_s28 + $0x48] sm:$0xff] }
  0x1d   : > { %v2071_v12 = vsel %vm272_vm0, %v278_v3, %v279_v4  ;;  %v276_v13 = vrot.slane %v2065_v10, 1  ;;  %v2075_v14 = vld [vmem:[%s2042_s28 + $0x40] sm:$0x3]  ;;  %v2078_v15 = vld [vmem:[%s2042_s28 + $0x30] sm:$0xff]  ;;  %v284_v18 = vrot.slane %v2068_v11, 1  ;;  %v288_v29 = vrot.slane %v2098_v24, 1 }
  0x1e   : > { %3772 = vst [vmem:[#allocation5_spill] sm:$0xff] %v2071_v12  ;;  %357 = vrot.lane.b32.xlu1 %v2071_v12, %s1959_s29  ;;  %v275_v16 = vsel %vm272_vm0, %v273_v6, %v274_v8  ;;  %v2085_v17 = vsel %vm272_vm0, %v279_v4, %v281_v9  ;;  %v286_v19 = vrot.slane %v2075_v14, 1  ;;  %v283_v21 = vrot.slane %v2078_v15, 1  ;;  %v2092_v22 = vld [vmem:[%s2042_s28 + $0x50] sm:$0xff]  ;;  %v2095_v23 = vld [vmem:[%s2042_s28 + $0x58] sm:$0x3] }
  0x1f   : > { %353 = vrot.lane.b32.xlu0 %v275_v16, %s1959_s29  ;;  %3773 = vst [vmem:[#allocation6_spill] sm:$0xff] %v2085_v17  ;;  %v277_v20 = vsel %vm272_vm0, %v274_v8, %v276_v13  ;;  %v289_v26 = vrot.slane %v2092_v22, 1  ;;  %v291_v27 = vrot.slane %v2095_v23, 1  ;;  %v2113_v30 = vld [vmem:[%s2042_s28 + $0x68] sm:$0xff]  ;;  %v2116_v31 = vld [vmem:[%s2042_s28 + $0x70] sm:$0x3] }
  0x20   : > { %v2104_v25 = vsel %vm272_vm0, %v284_v18, %v286_v19  ;;  %v2109_v28 = vsel %vm272_vm0, %v283_v21, %v284_v18  ;;  %v2119_v32 = vld [vmem:[%s2042_s28 + $0x60] sm:$0xff]  ;;  %v294_v34 = vrot.slane %v2113_v30, 1  ;;  %v296_v35 = vrot.slane %v2116_v31, 1  ;;  %v2138_v39 = vld [vmem:[%s2042_s28 + $0x88] sm:$0x3]  ;;  %v2141_v40 = vld [vmem:[%s2042_s28 + $0x78] sm:$0xff] }
  0x21   : > { %3774 = vst [vmem:[#allocation7_spill] sm:$0xff] %v2104_v25  ;;  %3775 = vst [vmem:[#allocation8_spill] sm:$0xff] %v2109_v28  ;;  %v2126_v33 = vsel %vm272_vm0, %v289_v26, %v291_v27  ;;  %v2131_v36 = vsel %vm272_vm0, %v288_v29, %v289_v26  ;;  %v293_v37 = vrot.slane %v2119_v32, 1  ;;  %v2135_v38 = vld [vmem:[%s2042_s28 + $0x80] sm:$0xff]  ;;  %v301_v43 = vrot.slane %v2138_v39, 1  ;;  %v2157_v46 = vld [vmem:[%s2042_s28 + $0x98] sm:$0xff] }
  0x22   : > { %359 = vrot.lane.b32.xlu1 %v2085_v17, %s1959_s29  ;;  %3776 = vst [vmem:[#allocation9_spill] sm:$0xff] %v2126_v33  ;;  %3777 = vst [vmem:[#allocation10_spill] sm:$0xff] %v2131_v36  ;;  %v2148_v41 = vsel %vm272_vm0, %v294_v34, %v296_v35  ;;  %v299_v42 = vrot.slane %v2135_v38, 1  ;;  %v298_v45 = vrot.slane %v2141_v40, 1  ;;  %v2160_v47 = vld [vmem:[%s2042_s28 + $0xa0] sm:$0x3] }
  0x23   : > { %355 = vrot.lane.b32.xlu0 %v277_v20, %s1959_s29  ;;  %3778 = vst [vmem:[#allocation11_spill] sm:$0xff] %v2148_v41  ;;  %v2153_v44 = vsel %vm272_vm0, %v293_v37, %v294_v34  ;;  %v2163_v48 = vld [vmem:[%s2042_s28 + $0x90] sm:$0xff]  ;;  %v304_v50 = vrot.slane %v2157_v46, 1  ;;  %v306_v51 = vrot.slane %v2160_v47, 1  ;;  %v2182_v55 = vld [vmem:[%s2042_s28 + $0xb8] sm:$0x3] }
  0x24   : > { %3779 = vst [vmem:[#allocation12_spill] sm:$0xff] %v2153_v44  ;;  %v2170_v49 = vsel %vm272_vm0, %v299_v42, %v301_v43  ;;  %v2175_v52 = vsel %vm272_vm0, %v298_v45, %v299_v42  ;;  %v303_v53 = vrot.slane %v2163_v48, 1  ;;  %v2179_v54 = vld [vmem:[%s2042_s28 + $0xb0] sm:$0xff]  ;;  %v2185_v56 = vld [vmem:[%s2042_s28 + $0xa8] sm:$0xff]  ;;  %v311_v59 = vrot.slane %v2182_v55, 1  ;;  %v2207_v3 = vld [vmem:[%s2042_s28 + $0xc0] sm:$0xff] }
  0x25   : > { %3780 = vst [vmem:[#allocation13_spill] sm:$0xff] %v2170_v49  ;;  %3781 = vst [vmem:[#allocation14_spill] sm:$0xff] %v2175_v52  ;;  %v2192_v57 = vsel %vm272_vm0, %v304_v50, %v306_v51  ;;  %v309_v58 = vrot.slane %v2179_v54, 1  ;;  %v308_v61 = vrot.slane %v2185_v56, 1  ;;  %v2201_v62 = vld [vmem:[%s2042_s28 + $0xc8] sm:$0xff]  ;;  %v313_v13 = vrot.slane %v2207_v3, 1 }
  0x26   : > { %363 = vrot.lane.b32.xlu1 %v2104_v25, %s1959_s29  ;;  %3782 = vst [vmem:[#allocation15_spill] sm:$0xff] %v2179_v54  ;;  %3783 = vst [vmem:[#allocation16_spill] sm:$0xff] %v2185_v56  ;;  %v2197_v60 = vsel %vm272_vm0, %v303_v53, %v304_v50  ;;  %v2204_v63 = vld [vmem:[%s2042_s28 + $0xd0] sm:$0x3]  ;;  %v314_v6 = vrot.slane %v2201_v62, 1  ;;  %v2223_v16 = vld [vmem:[%s2042_s28 + $0xe0] sm:$0xff] }
  0x27   : > { %361 = vrot.lane.b32.xlu0 %v2109_v28, %s1959_s29  ;;  %3784 = vst [vmem:[#allocation17_spill] sm:$0xff] %v2192_v57  ;;  %3785 = vst [vmem:[#allocation18_spill] sm:$0xff] %v2197_v60  ;;  %v2214_v4 = vsel %vm272_vm0, %v309_v58, %v311_v59  ;;  %v316_v8 = vrot.slane %v2204_v63, 1  ;;  %v2219_v9 = vsel %vm272_vm0, %v308_v61, %v309_v58  ;;  %v2226_v18 = vld [vmem:[%s2042_s28 + $0xe8] sm:$0x3]  ;;  %v2229_v19 = vld [vmem:[%s2042_s28 + $0xd8] sm:$0xff] }
  0x28   : > { %3786 = vst [vmem:[#allocation19_spill] sm:$0xff] %v2214_v4  ;;  %3787 = vst [vmem:[#allocation20_spill] sm:$0xff] %v2219_v9  ;;  %v319_v21 = vrot.slane %v2223_v16, 1  ;;  %v321_v26 = vrot.slane %v2226_v18, 1  ;;  %v2241_v27 = vsel %vm272_vm0, %v313_v13, %v314_v6  ;;  %v318_v29 = vrot.slane %v2229_v19, 1  ;;  %v2245_v34 = vld [vmem:[%s2042_s28 + $0xf8] sm:$0xff] }
  0x29   : > { %v2236_v20 = vsel %vm272_vm0, %v314_v6, %v316_v8  ;;  %v2248_v35 = vld [vmem:[%s2042_s28 + $0x100] sm:$0x3]  ;;  %v2251_v37 = vld [vmem:[%s2042_s28 + $0xf0] sm:$0xff]  ;;  %v324_v43 = vrot.slane %v2245_v34, 1  ;;  %v2270_v58 = vld [vmem:[%s2042_s28 + $0x118] sm:$0x3] }
  0x2a   : > { %367 = vrot.lane.b32.xlu1 %v2126_v33, %s1959_s29  ;;  %v2258_v42 = vsel %vm272_vm0, %v319_v21, %v321_v26  ;;  %v326_v45 = vrot.slane %v2248_v35, 1  ;;  %v2263_v50 = vsel %vm272_vm0, %v318_v29, %v319_v21  ;;  %v323_v51 = vrot.slane %v2251_v37, 1  ;;  %v2267_v53 = vld [vmem:[%s2042_s28 + $0x110] sm:$0xff]  ;;  %v2273_v59 = vld [vmem:[%s2042_s28 + $0x108] sm:$0xff]  ;;  %v2295_v12 = vld [vmem:[%s2042_s28 + $0x120] sm:$0xff]  ;;  %s163_s26 = scalar_lea.vmem [#allocation2], %s1751_s24 }
  0x2b   : > { %365 = vrot.lane.b32.xlu0 %v2131_v36, %s1959_s29  ;;  %3788 = vst [vmem:[#allocation21_spill] sm:$0xff] %v2263_v50  ;;  %v329_v6 = vrot.slane %v2267_v53, 1  ;;  %v331_v8 = vrot.slane %v2270_v58, 1  ;;  %v328_v21 = vrot.slane %v2273_v59, 1  ;;  %v2289_v26 = vld [vmem:[%s2042_s28 + $0x128] sm:$0xff]  ;;  %3791 = vst [vmem:[#allocation24_spill] sm:$0xff] %v2295_v12 }
  0x2c   : > { %v2280_v61 = vsel %vm272_vm0, %v324_v43, %v326_v45  ;;  %v2285_v13 = vsel %vm272_vm0, %v323_v51, %v324_v43  ;;  %v2292_v29 = vld [vmem:[%s2042_s28 + $0x130] sm:$0x3]  ;;  %v334_v43 = vrot.slane %v2289_v26, 1  ;;  %v333_v28 = vrot.slane %v2295_v12, 1  ;;  %v2311_v25 = vld [vmem:[%s2042_s28 + $0x140] sm:$0xff]  ;;  %s1688_s27 = sshll.u32 %s163_s26, 4  ;;  %s1689_s27 = int_to_ptr.vmem [resolvable:$true] %s1688_s27 }
  0x2d   : > { %3789 = vst [vmem:[#allocation22_spill] sm:$0xff] %v2280_v61  ;;  %3790 = vst [vmem:[#allocation23_spill] sm:$0xff] %v2285_v13  ;;  %v2302_v45 = vsel %vm272_vm0, %v329_v6, %v331_v8  ;;  %v336_v51 = vrot.slane %v2292_v29, 1  ;;  %v2307_v17 = vsel %vm272_vm0, %v328_v21, %v329_v6  ;;  %v339_v6 = vrot.slane %v2311_v25, 1 }
  0x2e   : > { %371 = vrot.lane.b32.xlu1 %v2148_v41, %s1959_s29  ;;  %3792 = vst [vmem:[#allocation25_spill] sm:$0xff] %v2302_v45  ;;  %3793 = vst [vmem:[#allocation26_spill] sm:$0xff] %v2307_v17  ;;  %v2329_v36 = vsel %vm272_vm0, %v333_v28, %v334_v43 }
  0x2f   : > { %369 = vrot.lane.b32.xlu0 %v2153_v44, %s1959_s29  ;;  %3794 = vst [vmem:[#allocation27_spill] sm:$0xff] %v2311_v25  ;;  %v2324_v8 = vsel %vm272_vm0, %v334_v43, %v336_v51  ;;  %3796 = vst [vmem:[#allocation29_spill] sm:$0xff] %v2329_v36  ;;  %v2333_v44 = vld [vmem:[%s2042_s28 + $0x158] sm:$0xff] }
  0x30   : > { %3795 = vst [vmem:[#allocation28_spill] sm:$0xff] %v2324_v8  ;;  %v344_v28 = vrot.slane %v2333_v44, 1 }
  0x32   : > { %375 = vrot.lane.b32.xlu1 %v2170_v49, %s1959_s29  ;;  %v2355_v49 = vld [vmem:[%s2042_s28 + $0x170] sm:$0xff] }
  0x33   : > { %373 = vrot.lane.b32.xlu0 %v2175_v52, %s1959_s29 }
  0x36   : > { %379 = vrot.lane.b32.xlu1 %v2192_v57, %s1959_s29 }
  0x37   : > { %377 = vrot.lane.b32.xlu0 %v2197_v60, %s1959_s29  ;;  %v2358_v60 = vld [vmem:[%s2042_s28 + $0x178] sm:$0x3] }
  0x3a   : > { %383 = vrot.lane.b32.xlu1 %v2214_v4, %s1959_s29 }
  0x3b   : > { %381 = vrot.lane.b32.xlu0 %v2219_v9, %s1959_s29 }
  0x3e   : > { %387 = vrot.lane.b32.xlu1 %v2236_v20, %s1959_s29 }
  0x3f   : > { %385 = vrot.lane.b32.xlu0 %v2241_v27, %s1959_s29 }
  0x42   : > { %391 = vrot.lane.b32.xlu1 %v2258_v42, %s1959_s29 }
  0x43   : > { %389 = vrot.lane.b32.xlu0 %v2263_v50, %s1959_s29  ;;  %v2712_v50 = vld [vmem:[%s2042_s28 + $0x188] sm:$0xff] }
  0x46   : > { %395 = vrot.lane.b32.xlu1 %v2280_v61, %s1959_s29  ;;  %v2314_v61 = vld [vmem:[%s2042_s28 + $0x148] sm:$0x3] }
  0x47   : > { %393 = vrot.lane.b32.xlu0 %v2285_v13, %s1959_s29  ;;  %v2317_v13 = vld [vmem:[%s2042_s28 + $0x138] sm:$0xff]  ;;  %v341_v21 = vrot.slane %v2314_v61, 1 }
  0x48   : > { %v338_v33 = vrot.slane %v2317_v13, 1 }
  0x49   : > { %v2346_v51 = vsel %vm272_vm0, %v339_v6, %v341_v21 }
  0x4a   : > { %399 = vrot.lane.b32.xlu1 %v2302_v45, %s1959_s29  ;;  %v2336_v45 = vld [vmem:[%s2042_s28 + $0x160] sm:$0x3]  ;;  %3797 = vst [vmem:[#allocation30_spill] sm:$0xff] %v2346_v51  ;;  %v2351_v41 = vsel %vm272_vm0, %v338_v33, %v339_v6  ;;  %v349_v33 = vrot.slane %v2355_v49, 1  ;;  %v351_v6 = vrot.slane %v2358_v60, 1 }
  0x4b   : > { %397 = vrot.lane.b32.xlu0 %v2307_v17, %s1959_s29  ;;  %v2339_v17 = vld [vmem:[%s2042_s28 + $0x150] sm:$0xff]  ;;  %v346_v43 = vrot.slane %v2336_v45, 1  ;;  %3798 = vst [vmem:[#allocation31_spill] sm:$0xff] %v2351_v41 }
  0x4c   : > { %v343_v52 = vrot.slane %v2339_v17, 1 }
  0x4d   : > { %v2368_v21 = vsel %vm272_vm0, %v344_v28, %v346_v43  ;;  %v451_v43 = vrot.slane %v2056_v5, 2 }
  0x4e   : > { %403 = vrot.lane.b32.xlu1 %v2324_v8, %s1959_s29  ;;  %v2361_v8 = vld [vmem:[%s2042_s28 + $0x168] sm:$0xff]  ;;  %3799 = vst [vmem:[#allocation32_spill] sm:$0xff] %v2368_v21 }
  0x4f   : > { %401 = vrot.lane.b32.xlu0 %v2329_v36, %s1959_s29  ;;  %v2373_v36 = vsel %vm272_vm0, %v343_v52, %v344_v28  ;;  %v348_v57 = vrot.slane %v2361_v8, 1  ;;  %v450_v52 = vrot.slane %v2051_v2, 2 }
  0x50   : > { %3800 = vst [vmem:[#allocation33_spill] sm:$0xff] %v2373_v36 }
  0x51   : > { %v2386_v9 = vsel %vm272_vm0, %v348_v57, %v349_v33  ;;  %v455_v57 = vrot.slane %v2045_v0, 2 }
  0x52   : > { %407 = vrot.lane.b32.xlu1 %v2346_v51, %s1959_s29  ;;  %v453_v51 = vrot.slane %v2065_v10, 2  ;;  %3801 = vst [vmem:[#allocation34_spill] sm:$0xff] %v2386_v9  ;;  %v452_v10 = vsel %vm449_vm1, %v450_v52, %v451_v43  ;;  %v468_v52 = vrot.slane %v2095_v23, 2 }
  0x53   : > { %405 = vrot.lane.b32.xlu0 %v2351_v41, %s1959_s29  ;;  %v2381_v41 = vsel %vm272_vm0, %v349_v33, %v351_v6  ;;  %v456_v6 = vrot.slane %v2048_v1, 2 }
  0x54   : > { %v454_v28 = vsel %vm449_vm1, %v451_v43, %v453_v51  ;;  %v463_v51 = vrot.slane %v2075_v14, 2 }
  0x56   : > { %411 = vrot.lane.b32.xlu1 %v2368_v21, %s1959_s29  ;;  %v461_v21 = vrot.slane %v2068_v11, 2 }
  0x57   : > { %409 = vrot.lane.b32.xlu0 %v2373_v36, %s1959_s29  ;;  %v458_v36 = vrot.slane %v2060_v7, 2  ;;  %v460_v7 = vrot.slane %v2078_v15, 2 }
  0x58   : > { %v2414_v43 = vsel %vm449_vm1, %v461_v21, %v463_v51 }
  0x59   : > { %v2401_v33 = vsel %vm449_vm1, %v456_v6, %v458_v36  ;;  %3804 = vst [vmem:[#allocation37_spill] sm:$0xff] %v2414_v43  ;;  %v466_v36 = vrot.slane %v2092_v22, 2  ;;  %v2419_v14 = vsel %vm449_vm1, %v460_v7, %v461_v21  ;;  %v470_v21 = vrot.slane %v2119_v32, 2 }
  0x5a   : > { %415 = vrot.lane.b32.xlu1 %v2381_v41, %s1959_s29  ;;  %3802 = vst [vmem:[#allocation35_spill] sm:$0xff] %v2401_v33  ;;  %3805 = vst [vmem:[#allocation38_spill] sm:$0xff] %v2419_v14  ;;  %v476_v7 = vrot.slane %v2135_v38, 2 }
  0x5b   : > { %413 = vrot.lane.b32.xlu0 %v2386_v9, %s1959_s29  ;;  %v2406_v9 = vsel %vm449_vm1, %v455_v57, %v456_v6  ;;  %v2427_v6 = vsel %vm449_vm1, %v466_v36, %v468_v52  ;;  %v473_v57 = vrot.slane %v2116_v31, 2  ;;  %v478_v52 = vrot.slane %v2138_v39, 2 }
  0x5c   : > { %3803 = vst [vmem:[#allocation36_spill] sm:$0xff] %v2406_v9  ;;  %3806 = vst [vmem:[#allocation39_spill] sm:$0xff] %v2427_v6 }
  0x5e   : > { %532 = vrot.lane.b32.xlu1 %v454_v28, %s1960_s30  ;;  %v465_v28 = vrot.slane %v2098_v24, 2 }
  0x5f   : > { %530 = vrot.lane.b32.xlu0 %v452_v10, %s1960_s30  ;;  %v471_v10 = vrot.slane %v2113_v30, 2 }
  0x60   : > { %v2432_v23 = vsel %vm449_vm1, %v465_v28, %v466_v36  ;;  %v475_v36 = vrot.slane %v2141_v40, 2  ;;  %v2453_v28 = vsel %vm449_vm1, %v476_v7, %v478_v52  ;;  %v486_v52 = vrot.slane %v2179_v54, 2 }
  0x61   : > { %3807 = vst [vmem:[#allocation40_spill] sm:$0xff] %v2432_v23  ;;  %v2440_v51 = vsel %vm449_vm1, %v471_v10, %v473_v57  ;;  %v2445_v31 = vsel %vm449_vm1, %v470_v21, %v471_v10  ;;  %3810 = vst [vmem:[#allocation43_spill] sm:$0xff] %v2453_v28  ;;  %v481_v57 = vrot.slane %v2157_v46, 2  ;;  %v480_v10 = vrot.slane %v2163_v48, 2 }
  0x62   : > { %536 = vrot.lane.b32.xlu1 %v2401_v33, %s1960_s30  ;;  %3808 = vst [vmem:[#allocation41_spill] sm:$0xff] %v2440_v51  ;;  %3809 = vst [vmem:[#allocation42_spill] sm:$0xff] %v2445_v31  ;;  %v2458_v39 = vsel %vm449_vm1, %v475_v36, %v476_v7  ;;  %v488_v33 = vrot.slane %v2182_v55, 2  ;;  %v485_v7 = vrot.slane %v2185_v56, 2 }
  0x63   : > { %534 = vrot.lane.b32.xlu0 %v2406_v9, %s1960_s30  ;;  %v483_v9 = vrot.slane %v2160_v47, 2  ;;  %3811 = vst [vmem:[#allocation44_spill] sm:$0xff] %v2458_v39  ;;  %v2471_v47 = vsel %vm449_vm1, %v480_v10, %v481_v57 }
  0x64   : > { %3813 = vst [vmem:[#allocation46_spill] sm:$0xff] %v2471_v47  ;;  %v2479_v36 = vsel %vm449_vm1, %v486_v52, %v488_v33  ;;  %v2484_v55 = vsel %vm449_vm1, %v485_v7, %v486_v52  ;;  %v496_v33 = vrot.slane %v2223_v16, 2  ;;  %v495_v52 = vrot.slane %v2229_v19, 2 }
  0x65   : > { %v2466_v21 = vsel %vm449_vm1, %v481_v57, %v483_v9  ;;  %3814 = vst [vmem:[#allocation47_spill] sm:$0xff] %v2479_v36  ;;  %v491_v9 = vrot.slane %v2201_v62, 2  ;;  %3815 = vst [vmem:[#allocation48_spill] sm:$0xff] %v2484_v55  ;;  %v490_v57 = vrot.slane %v2207_v3, 2 }
  0x66   : > { %540 = vrot.lane.b32.xlu1 %v2414_v43, %s1960_s30  ;;  %3812 = vst [vmem:[#allocation45_spill] sm:$0xff] %v2466_v21  ;;  %v498_v43 = vrot.slane %v2226_v18, 2  ;;  %v2510_v18 = vsel %vm449_vm1, %v495_v52, %v496_v33 }
  0x67   : > { %538 = vrot.lane.b32.xlu0 %v2419_v14, %s1960_s30  ;;  %v493_v14 = vrot.slane %v2204_v63, 2  ;;  %v2497_v63 = vsel %vm449_vm1, %v490_v57, %v491_v9  ;;  %3816 = vst [vmem:[#allocation49_spill] sm:$0xff] %v2510_v18 }
  0x68   : > { %v2505_v7 = vsel %vm449_vm1, %v496_v33, %v498_v43  ;;  %v506_v43 = vrot.slane %v2267_v53, 2  ;;  %v505_v33 = vrot.slane %v2273_v59, 2 }
  0x69   : > { %v2492_v10 = vsel %vm449_vm1, %v491_v9, %v493_v14  ;;  %v501_v14 = vrot.slane %v2245_v34, 2  ;;  %v500_v9 = vrot.slane %v2251_v37, 2 }
  0x6a   : > { %544 = vrot.lane.b32.xlu1 %v2427_v6, %s1960_s30  ;;  %v508_v6 = vrot.slane %v2270_v58, 2  ;;  %v2536_v58 = vsel %vm449_vm1, %v505_v33, %v506_v43 }
  0x6b   : > { %542 = vrot.lane.b32.xlu0 %v2432_v23, %s1960_s30  ;;  %v503_v23 = vrot.slane %v2248_v35, 2  ;;  %v2523_v35 = vsel %vm449_vm1, %v500_v9, %v501_v14  ;;  %3820 = vst [vmem:[#allocation53_spill] sm:$0xff] %v2536_v58 }
  0x6c   : > { %3818 = vst [vmem:[#allocation51_spill] sm:$0xff] %v2523_v35  ;;  %v2531_v52 = vsel %vm449_vm1, %v506_v43, %v508_v6  ;;  %v516_v6 = vrot.slane %v2311_v25, 2  ;;  %v515_v43 = vrot.slane %v2317_v13, 2 }
  0x6d   : > { %v2518_v57 = vsel %vm449_vm1, %v501_v14, %v503_v23  ;;  %3819 = vst [vmem:[#allocation52_spill] sm:$0xff] %v2531_v52  ;;  %v511_v23 = vrot.slane %v2289_v26, 2  ;;  %v510_v14 = vrot.slane %v2295_v12, 2 }
  0x6e   : > { %548 = vrot.lane.b32.xlu1 %v2440_v51, %s1960_s30  ;;  %3817 = vst [vmem:[#allocation50_spill] sm:$0xff] %v2518_v57 }
  0x6f   : > { %546 = vrot.lane.b32.xlu0 %v2445_v31, %s1960_s30  ;;  %v513_v31 = vrot.slane %v2292_v29, 2  ;;  %v2549_v29 = vsel %vm449_vm1, %v510_v14, %v511_v23 }
  0x70   : > { %3822 = vst [vmem:[#allocation55_spill] sm:$0xff] %v2549_v29 }
  0x71   : > { %v2544_v9 = vsel %vm449_vm1, %v511_v23, %v513_v31  ;;  %v521_v31 = vrot.slane %v2333_v44, 2  ;;  %v520_v23 = vrot.slane %v2339_v17, 2 }
  0x72   : > { %552 = vrot.lane.b32.xlu1 %v2453_v28, %s1960_s30  ;;  %3821 = vst [vmem:[#allocation54_spill] sm:$0xff] %v2544_v9 }
  0x73   : > { %550 = vrot.lane.b32.xlu0 %v2458_v39, %s1960_s30 }
  0x76   : > { %556 = vrot.lane.b32.xlu1 %v2466_v21, %s1960_s30 }
  0x77   : > { %554 = vrot.lane.b32.xlu0 %v2471_v47, %s1960_s30 }
  0x7a   : > { %560 = vrot.lane.b32.xlu1 %v2479_v36, %s1960_s30 }
  0x7b   : > { %558 = vrot.lane.b32.xlu0 %v2484_v55, %s1960_s30 }
  0x7e   : > { %564 = vrot.lane.b32.xlu1 %v2492_v10, %s1960_s30 }
  0x7f   : > { %562 = vrot.lane.b32.xlu0 %v2497_v63, %s1960_s30 }
  0x82   : > { %568 = vrot.lane.b32.xlu1 %v2505_v7, %s1960_s30 }
  0x83   : > { %566 = vrot.lane.b32.xlu0 %v2510_v18, %s1960_s30 }
  0x86   : > { %572 = vrot.lane.b32.xlu1 %v2518_v57, %s1960_s30  ;;  %v523_v57 = vrot.slane %v2336_v45, 2  ;;  %v526_v45 = vrot.slane %v2355_v49, 2 }
  0x87   : > { %570 = vrot.lane.b32.xlu0 %v2523_v35, %s1960_s30  ;;  %v518_v35 = vrot.slane %v2314_v61, 2  ;;  %v2564_v61 = vsel %vm449_vm1, %v515_v43, %v516_v6  ;;  %v525_v43 = vrot.slane %v2361_v8, 2 }
  0x88   : > { %3824 = vst [vmem:[#allocation57_spill] sm:$0xff] %v2564_v61 }
  0x89   : > { %v2557_v33 = vsel %vm449_vm1, %v516_v6, %v518_v35  ;;  %v2574_v35 = vsel %vm449_vm1, %v521_v31, %v523_v57  ;;  %v2581_v6 = vsel %vm449_vm1, %v520_v23, %v521_v31 }
  0x8a   : > { %576 = vrot.lane.b32.xlu1 %v2531_v52, %s1960_s30  ;;  %3823 = vst [vmem:[#allocation56_spill] sm:$0xff] %v2557_v33  ;;  %3825 = vst [vmem:[#allocation58_spill] sm:$0xff] %v2574_v35  ;;  %v528_v52 = vrot.slane %v2358_v60, 2  ;;  %v2596_v60 = vsel %vm449_vm1, %v525_v43, %v526_v45 }
  0x8b   : > { %574 = vrot.lane.b32.xlu0 %v2536_v58, %s1960_s30  ;;  %3826 = vst [vmem:[#allocation59_spill] sm:$0xff] %v2581_v6  ;;  %3828 = vst [vmem:[#allocation61_spill] sm:$0xff] %v2596_v60 }
  0x8c   : > { %v2591_v57 = vsel %vm449_vm1, %v526_v45, %v528_v52 }
  0x8d   : > { %3827 = vst [vmem:[#allocation60_spill] sm:$0xff] %v2591_v57 }
  0x8e   : > { %580 = vrot.lane.b32.xlu1 %v2544_v9, %s1960_s30 }
  0x8f   : > { %578 = vrot.lane.b32.xlu0 %v2549_v29, %s1960_s30 }
  0x90   : > { %v2561_v58 = vpop.permute.xlu1 %357 }
  0x91   : > { %v2567_v14 = vpop.permute.xlu0 %353 }
  0x92   : > { %584 = vrot.lane.b32.xlu1 %v2557_v33, %s1960_s30 }
  0x93   : > { %582 = vrot.lane.b32.xlu0 %v2564_v61, %s1960_s30 }
  0x94   : > { %v2578_v29 = vpop.permute.xlu1 %359 }
  0x95   : > { %v2584_v51 = vpop.permute.xlu0 %355 }
  0x96   : > { %588 = vrot.lane.b32.xlu1 %v2574_v35, %s1960_s30 }
  0x97   : > { %586 = vrot.lane.b32.xlu0 %v2581_v6, %s1960_s30 }
  0x98   : > { %v2593_v9 = vpop.permute.xlu1 %363 }
  0x99   : > { %v2598_v31 = vpop.permute.xlu0 %361 }
  0x9a   : > { %592 = vrot.lane.b32.xlu1 %v2591_v57, %s1960_s30 }
  0x9b   : > { %590 = vrot.lane.b32.xlu0 %v2596_v60, %s1960_s30  ;;  %s1686_s30 = scalar_lea.hbm %s3663_s3, %s1791_s25 }
  0x9c   : > { %v2604_v23 = vpop.permute.xlu1 %367 }
  0x9d   : > { %v2606_v39 = vpop.permute.xlu0 %365 }
  0x9e   : > { %630 = vrot.lane.b32.xlu1 %v2048_v1, %s1961_s4 }
  0x9f   : > { %628 = vrot.lane.b32.xlu0 %v2045_v0, %s1961_s4 }
  0xa0   : > { %v2612_v52 = vpop.permute.xlu1 %371 }
  0xa1   : > { %v2614_v45 = vpop.permute.xlu0 %369 }
  0xa2   : > { %634 = vrot.lane.b32.xlu1 %v2068_v11, %s1961_s4 }
  0xa3   : > { %632 = vrot.lane.b32.xlu0 %v2078_v15, %s1961_s4 }
  0xa4   : > { %v2620_v43 = vpop.permute.xlu1 %375 }
  0xa5   : > { %v2622_v61 = vpop.permute.xlu0 %373 }
  0xa6   : > { %638 = vrot.lane.b32.xlu1 %v2092_v22, %s1961_s4 }
  0xa7   : > { %636 = vrot.lane.b32.xlu0 %v2098_v24, %s1961_s4 }
  0xa8   : > { %v2628_v28 = vpop.permute.xlu1 %379 }
  0xa9   : > { %3829 = vst [vmem:[#allocation62_spill] sm:$0xff] %v2628_v28  ;;  %v2630_v33 = vpop.permute.xlu0 %377 }
  0xaa   : > { %642 = vrot.lane.b32.xlu1 %v2113_v30, %s1961_s4 }
  0xab   : > { %640 = vrot.lane.b32.xlu0 %v2119_v32, %s1961_s4 }
  0xac   : > { %v2636_v47 = vpop.permute.xlu1 %383 }
  0xad   : > { %3830 = vst [vmem:[#allocation63_spill] sm:$0xff] %v2636_v47  ;;  %v2638_v6 = vpop.permute.xlu0 %381 }
  0xae   : > { %3831 = vst [vmem:[#allocation64_spill] sm:$0xff] %v2638_v6  ;;  %646 = vrot.lane.b32.xlu1 %v2135_v38, %s1961_s4 }
  0xaf   : > { %644 = vrot.lane.b32.xlu0 %v2141_v40, %s1961_s4 }
  0xb0   : > { %v2644_v21 = vpop.permute.xlu1 %387 }
  0xb1   : > { %v2646_v28 = vpop.permute.xlu0 %385 }
  0xb2   : > { %650 = vrot.lane.b32.xlu1 %v2157_v46, %s1961_s4 }
  0xb3   : > { %648 = vrot.lane.b32.xlu0 %v2163_v48, %s1961_s4 }
  0xb4   : > { %v2652_v35 = vpop.permute.xlu1 %391 }
  0xb5   : > { %v2654_v47 = vpop.permute.xlu0 %389 }
  0xb6   : > { %654 = vrot.lane.b32.xlu1 %v2179_v54, %s1961_s4 }
  0xb7   : > { %652 = vrot.lane.b32.xlu0 %v2185_v56, %s1961_s4 }
  0xb8   : > { %v2660_v6 = vpop.permute.xlu1 %395 }
  0xb9   : > { %v2662_v55 = vpop.permute.xlu0 %393 }
  0xba   : > { %658 = vrot.lane.b32.xlu1 %v2201_v62, %s1961_s4 }
  0xbb   : > { %656 = vrot.lane.b32.xlu0 %v2207_v3, %s1961_s4 }
  0xbc   : > { %v2668_v46 = vpop.permute.xlu1 %399 }
  0xbd   : > { %v2670_v60 = vpop.permute.xlu0 %397 }
  0xbe   : > { %662 = vrot.lane.b32.xlu1 %v2223_v16, %s1961_s4 }
  0xbf   : > { %660 = vrot.lane.b32.xlu0 %v2229_v19, %s1961_s4 }
  0xc0   : > { %v2676_v56 = vpop.permute.xlu1 %403 }
  0xc1   : > { %v2678_v54 = vpop.permute.xlu0 %401 }
  0xc2   : > { %3832 = vst [vmem:[#allocation65_spill] sm:$0xff] %v2678_v54  ;;  %666 = vrot.lane.b32.xlu1 %v2245_v34, %s1961_s4 }
  0xc3   : > { %664 = vrot.lane.b32.xlu0 %v2251_v37, %s1961_s4 }
  0xc4   : > { %v2684_v18 = vpop.permute.xlu1 %407 }
  0xc5   : > { %3833 = vst [vmem:[#allocation66_spill] sm:$0xff] %v2684_v18  ;;  %v2686_v36 = vpop.permute.xlu0 %405 }
  0xc6   : > { %3834 = vst [vmem:[#allocation67_spill] sm:$0xff] %v2686_v36  ;;  %670 = vrot.lane.b32.xlu1 %v2267_v53, %s1961_s4 }
  0xc7   : > { %668 = vrot.lane.b32.xlu0 %v2273_v59, %s1961_s4 }
  0xc8   : > { %v2692_v4 = vpop.permute.xlu1 %411 }
  0xc9   : > { %3835 = vst [vmem:[#allocation68_spill] sm:$0xff] %v2692_v4  ;;  %v2694_v57 = vpop.permute.xlu0 %409 }
  0xca   : > { %3836 = vst [vmem:[#allocation69_spill] sm:$0xff] %v2694_v57  ;;  %674 = vrot.lane.b32.xlu1 %v2289_v26, %s1961_s4  ;;  %v1230_v57 = vsel %vm1228_vm2, %v2056_v5, %v2584_v51  ;;  %v726_v5 = vrot.slane %v2712_v50, 1 }
  0xcb   : > { %672 = vrot.lane.b32.xlu0 %v2295_v12, %s1961_s4  ;;  %v219_v12 = vld [vmem:[%s2042_s28 + $0x190] sm:$0x3] }
  0xcc   : > { %v2700_v18 = vpop.permute.xlu1 %415  ;;  %v728_v51 = vrot.slane %v219_v12, 1 }
  0xcd   : > { %3837 = vst [vmem:[#allocation70_spill] sm:$0xff] %v2700_v18  ;;  %v2702_v36 = vpop.permute.xlu0 %413 }
  0xce   : > { %3838 = vst [vmem:[#allocation71_spill] sm:$0xff] %v2702_v36  ;;  %678 = vrot.lane.b32.xlu1 %v2311_v25, %s1961_s4  ;;  %v1229_v36 = vsel %vm1228_vm2, %v2051_v2, %v2567_v14  ;;  %v1232_v2 = vsel %vm1228_vm2, %v2048_v1, %v2578_v29  ;;  %v2746_v1 = vsel %vm272_vm0, %v726_v5, %v728_v51  ;;  %v827_v29 = vrot.slane %v2712_v50, 2 }
  0xcf   : > { %676 = vrot.lane.b32.xlu0 %v2317_v13, %s1961_s4 }
  0xd0   : > { %v533_v4 = vpop.permute.xlu1 %532 }
  0xd1   : > { %v2719_v18 = vsel %vm1261_vm3, %v1230_v57, %v533_v4  ;;  %v531_v25 = vpop.permute.xlu0 %530  ;;  %v1231_v4 = vsel %vm1228_vm2, %v2045_v0, %v2561_v58  ;;  %v1234_v0 = vsel %vm1228_vm2, %v2068_v11, %v2593_v9  ;;  %v1235_v9 = vsel %vm1228_vm2, %v2098_v24, %v2606_v39  ;;  %v2793_v39 = vld [vmem:[%s2042_s28 + $0x180] sm:$0xff] }
  0xd2   : > { %3839 = vst [vmem:[#allocation72_spill] sm:$0xff] %v2719_v18  ;;  %v2722_v54 = vsel %vm1261_vm3, %v1229_v36, %v531_v25  ;;  %682 = vrot.lane.b32.xlu1 %v2333_v44, %s1961_s4  ;;  %v1238_v24 = vsel %vm1228_vm2, %v2113_v30, %v2612_v52  ;;  %v725_v30 = vrot.slane %v2793_v39, 1  ;;  %v3877_v18 = vld [vmem:[#allocation32_spill] sm:$0xff] }
  0xd3   : > { %3840 = vst [vmem:[#allocation73_spill] sm:$0xff] %v2722_v54  ;;  %680 = vrot.lane.b32.xlu0 %v2339_v17, %s1961_s4  ;;  %v829_v54 = vrot.slane %v219_v12, 2  ;;  %v1236_v12 = vsel %vm1228_vm2, %v2092_v22, %v2604_v23  ;;  %v2787_v22 = vld [vmem:[%s2042_s28 + $0x1a0] sm:$0xff]  ;;  %v1237_v23 = vsel %vm1228_vm2, %v2119_v32, %v2614_v45  ;;  %v1240_v32 = vsel %vm1228_vm2, %v2135_v38, %v2620_v43 }
  0xd4   : > { %v537_v14 = vpop.permute.xlu1 %536  ;;  %v1027_v52 = vrot.slane %v2787_v22, 1  ;;  %v1128_v38 = vrot.slane %v2787_v22, 2  ;;  %v2829_v43 = vsel %vm272_vm0, %v725_v30, %v726_v5 }
  0xd5   : > { %v2736_v25 = vsel %vm1261_vm3, %v1232_v2, %v537_v14  ;;  %v535_v36 = vpop.permute.xlu0 %534  ;;  %v1233_v2 = vsel %vm1228_vm2, %v2078_v15, %v2598_v31  ;;  %v2768_v11 = vsel %vm449_vm1, %v827_v29, %v829_v54 }
  0xd6   : > { %3841 = vst [vmem:[#allocation74_spill] sm:$0xff] %v2736_v25  ;;  %v2739_v57 = vsel %vm1261_vm3, %v1231_v4, %v535_v36  ;;  %686 = vrot.lane.b32.xlu1 %v2355_v49, %s1961_s4  ;;  %v3885_v25 = vld [vmem:[#allocation15_spill] sm:$0xff] }
  0xd7   : > { %3842 = vst [vmem:[#allocation75_spill] sm:$0xff] %v2739_v57  ;;  %684 = vrot.lane.b32.xlu0 %v2361_v8, %s1961_s4  ;;  %v3879_v57 = vld [vmem:[#allocation17_spill] sm:$0xff] }
  0xd8   : > { %v541_v58 = vpop.permute.xlu1 %540 }
  0xd9   : > { %v2756_v14 = vsel %vm1261_vm3, %v1234_v0, %v541_v58  ;;  %v539_v4 = vpop.permute.xlu0 %538 }
  0xda   : > { %3843 = vst [vmem:[#allocation76_spill] sm:$0xff] %v2756_v14  ;;  %v2759_v51 = vsel %vm1261_vm3, %v1233_v2, %v539_v4  ;;  %792 = vrot.lane.b32.xlu1 %v2746_v1, %s1962_s5  ;;  %v222_v4 = vld [vmem:[%s2042_s28 + $0x1a8] sm:$0x3] }
  0xdb   : > { %3844 = vst [vmem:[#allocation77_spill] sm:$0xff] %v2759_v51  ;;  %690 = vrot.lane.b32.xlu0 %v2712_v50, %s1961_s4  ;;  %v3892_v51 = vld [vmem:[#allocation18_spill] sm:$0xff] }
  0xdc   : > { %v545_v15 = vpop.permute.xlu1 %544 }
  0xdd   : > { %v2777_v31 = vsel %vm1261_vm3, %v1236_v12, %v545_v15  ;;  %v543_v36 = vpop.permute.xlu0 %542  ;;  %v1029_v15 = vrot.slane %v222_v4, 1 }
  0xde   : > { %3845 = vst [vmem:[#allocation78_spill] sm:$0xff] %v2777_v31  ;;  %v2780_v0 = vsel %vm1261_vm3, %v1235_v9, %v543_v36  ;;  %893 = vrot.lane.b32.xlu1 %v2768_v11, %s1963_s6  ;;  %v1239_v9 = vsel %vm1228_vm2, %v2141_v40, %v2622_v61 }
  0xdf   : > { %3846 = vst [vmem:[#allocation79_spill] sm:$0xff] %v2780_v0  ;;  %760 = vrot.lane.b32.xlu0 %v2236_v20, %s1962_s5  ;;  %v1030_v61 = vsel %vm272_vm0, %v1027_v52, %v1029_v15 }
  0xe0   : > { %v549_v54 = vpop.permute.xlu1 %548 }
  0xe1   : > { %v2799_v58 = vsel %vm1261_vm3, %v1238_v24, %v549_v54  ;;  %v547_v2 = vpop.permute.xlu0 %546 }
  0xe2   : > { %v2803_v12 = vsel %vm1261_vm3, %v1237_v23, %v547_v2  ;;  %991 = vrot.lane.b32.xlu1 %v2787_v22, %s1964_s7  ;;  %v1130_v23 = vrot.slane %v222_v4, 2  ;;  %v1241_v2 = vsel %vm1228_vm2, %v2163_v48, %v2630_v33  ;;  %v826_v22 = vrot.slane %v2793_v39, 2 }
  0xe3   : > { %861 = vrot.lane.b32.xlu0 %v2492_v10, %s1963_s6  ;;  %v1246_v33 = vsel %vm1228_vm2, %v2201_v62, %v2644_v21  ;;  %v1248_v21 = vsel %vm1228_vm2, %v2223_v16, %v2652_v35 }
  0xe4   : > { %v553_v45 = vpop.permute.xlu1 %552  ;;  %v1131_v5 = vsel %vm449_vm1, %v1128_v38, %v1130_v23  ;;  %v2855_v48 = vsel %vm449_vm1, %v826_v22, %v827_v29  ;;  %v220_v22 = vld [vmem:[%s2042_s28 + $0x198] sm:$0xff] }
  0xe5   : > { %v2818_v36 = vsel %vm1261_vm3, %v1240_v32, %v553_v45  ;;  %v551_v24 = vpop.permute.xlu0 %550 }
  0xe6   : > { %v2821_v54 = vsel %vm1261_vm3, %v1239_v9, %v551_v24  ;;  %959 = vrot.lane.b32.xlu1 %v2223_v16, %s1964_s7  ;;  %v1245_v9 = vsel %vm1228_vm2, %v2207_v3, %v2646_v28  ;;  %v1247_v28 = vsel %vm1228_vm2, %v2229_v19, %v2654_v47  ;;  %v1250_v16 = vsel %vm1228_vm2, %v2245_v34, %v2660_v6 }
  0xe7   : > { %688 = vrot.lane.b32.xlu0 %v2793_v39, %s1961_s4  ;;  %v1026_v47 = vrot.slane %v220_v22, 1  ;;  %v1252_v34 = vsel %vm1228_vm2, %v2267_v53, %v2668_v46  ;;  %v1254_v46 = vsel %vm1228_vm2, %v2289_v26, %v2676_v56  ;;  %s1674_s4 = scalar_lea.sflag [#allocation3], %s161_s20 }
  0xe8   : > { %v2831_v40 = vpop.permute.xlu1 %556 }
  0xe9   : > { %v555_v32 = vpop.permute.xlu0 %554 }
  0xea   : > { %v2838_v45 = vsel %vm1261_vm3, %v1241_v2, %v555_v32  ;;  %790 = vrot.lane.b32.xlu1 %v2829_v43, %s1962_s5 }
  0xeb   : > { %1093 = vrot.lane.b32.xlu0 %v1030_v61, %s1965_s8 }
  0xec   : > { %v2845_v4 = vpop.permute.xlu1 %560 }
  0xed   : > { %v2847_v30 = vpop.permute.xlu0 %558 }
  0xee   : > { %1194 = vrot.lane.b32.xlu1 %v1131_v5, %s1966_s9 }
  0xef   : > { %1061 = vrot.lane.b32.xlu0 %v2258_v42, %s1965_s8 }
  0xf0   : > { %v565_v15 = vpop.permute.xlu1 %564 }
  0xf1   : > { %v2864_v24 = vsel %vm1261_vm3, %v1246_v33, %v565_v15  ;;  %v563_v23 = vpop.permute.xlu0 %562  ;;  %v1249_v33 = vsel %vm1228_vm2, %v2251_v37, %v2662_v55  ;;  %v1028_v37 = vsel %vm272_vm0, %v1026_v47, %v1027_v52  ;;  %v1251_v55 = vsel %vm1228_vm2, %v2273_v59, %v2670_v60  ;;  %v3855_v59 = vld [vmem:[#allocation65_spill] sm:$0xff]  ;;  %v3856_v60 = vld [vmem:[#allocation24_spill] sm:$0xff]  ;;  %v3858_v47 = vld [vmem:[#allocation66_spill] sm:$0xff] }
  0xf2   : > { %3847 = vst [vmem:[#allocation80_spill] sm:$0xff] %v2864_v24  ;;  %v2867_v61 = vsel %vm1261_vm3, %v1245_v9, %v563_v23  ;;  %891 = vrot.lane.b32.xlu1 %v2855_v48, %s1963_s6  ;;  %v3878_v24 = vld [vmem:[#allocation58_spill] sm:$0xff] }
  0xf3   : > { %3848 = vst [vmem:[#allocation81_spill] sm:$0xff] %v2867_v61  ;;  %758 = vrot.lane.b32.xlu0 %v2241_v27, %s1962_s5 }
  0xf4   : > { %v569_v29 = vpop.permute.xlu1 %568 }
  0xf5   : > { %v2880_v2 = vsel %vm1261_vm3, %v1248_v21, %v569_v29  ;;  %v567_v32 = vpop.permute.xlu0 %566  ;;  %v1127_v21 = vrot.slane %v220_v22, 2 }
  0xf6   : > { %3849 = vst [vmem:[#allocation82_spill] sm:$0xff] %v2880_v2  ;;  %v2884_v5 = vsel %vm1261_vm3, %v1247_v28, %v567_v32  ;;  %859 = vrot.lane.b32.xlu1 %v2497_v63, %s1963_s6  ;;  %v1253_v32 = vsel %vm1228_vm2, %v3856_v60, %v3855_v59 }
  0xf7   : > { %3850 = vst [vmem:[#allocation83_spill] sm:$0xff] %v2884_v5  ;;  %1162 = vrot.lane.b32.xlu0 %v2505_v7, %s1966_s9  ;;  %v1129_v53 = vsel %vm449_vm1, %v1127_v21, %v1128_v38  ;;  %v3857_v38 = vld [vmem:[#allocation21_spill] sm:$0xff] }
  0xf8   : > { %v573_v35 = vpop.permute.xlu1 %572  ;;  %v3882_v5 = vld [vmem:[#allocation45_spill] sm:$0xff] }
  0xf9   : > { %v2897_v15 = vsel %vm1261_vm3, %v1250_v16, %v573_v35  ;;  %v571_v9 = vpop.permute.xlu0 %570 }
  0xfa   : > { %3851 = vst [vmem:[#allocation84_spill] sm:$0xff] %v2897_v15  ;;  %v2900_v23 = vsel %vm1261_vm3, %v1249_v33, %v571_v9  ;;  %957 = vrot.lane.b32.xlu1 %v2229_v19, %s1964_s7  ;;  %v3859_v33 = vld [vmem:[#allocation27_spill] sm:$0xff]  ;;  %v3895_v15 = vld [vmem:[#allocation30_spill] sm:$0xff] }
  0xfb   : > { %3852 = vst [vmem:[#allocation85_spill] sm:$0xff] %v2900_v23  ;;  %989 = vrot.lane.b32.xlu0 %v220_v22, %s1964_s7  ;;  %v1256_v56 = vsel %vm1228_vm2, %v3859_v33, %v3858_v47  ;;  %v3860_v9 = vld [vmem:[#allocation67_spill] sm:$0xff]  ;;  %v3867_v47 = vld [vmem:[#allocation34_spill] sm:$0xff] }
  0xfc   : > { %v577_v6 = vpop.permute.xlu1 %576  ;;  %v1255_v21 = vsel %vm1228_vm2, %v2317_v13, %v3860_v9  ;;  %v3864_v13 = vld [vmem:[#allocation49_spill] sm:$0xff]  ;;  %v3873_v9 = vld [vmem:[#allocation20_spill] sm:$0xff]  ;;  %v3893_v23 = vld [vmem:[#allocation46_spill] sm:$0xff] }
  0xfd   : > { %v2913_v29 = vsel %vm1261_vm3, %v1252_v34, %v577_v6  ;;  %v575_v28 = vpop.permute.xlu0 %574 }
  0xfe   : > { %3853 = vst [vmem:[#allocation86_spill] sm:$0xff] %v2913_v29  ;;  %v2916_v19 = vsel %vm1261_vm3, %v1251_v55, %v575_v28  ;;  %788 = vrot.lane.b32.xlu1 %v2381_v41, %s1962_s5  ;;  %v3861_v55 = vld [vmem:[#allocation60_spill] sm:$0xff]  ;;  %v3862_v28 = vld [vmem:[#allocation19_spill] sm:$0xff] }
  0xff   : > { %3854 = vst [vmem:[#allocation87_spill] sm:$0xff] %v2916_v19  ;;  %1091 = vrot.lane.b32.xlu0 %v1028_v37, %s1965_s8  ;;  %v3897_v19 = vld [vmem:[#allocation13_spill] sm:$0xff]  ;;  %v3901_v29 = vld [vmem:[#allocation63_spill] sm:$0xff] }
 0x100   : > { %v581_v52 = vpop.permute.xlu1 %580 }
 0x101   : > { %v2929_v22 = vsel %vm1261_vm3, %v1254_v46, %v581_v52  ;;  %v579_v16 = vpop.permute.xlu0 %578  ;;  %v3863_v52 = vld [vmem:[#allocation47_spill] sm:$0xff] }
 0x102   : > { %v2932_v35 = vsel %vm1261_vm3, %v1253_v32, %v579_v16  ;;  %1192 = vrot.lane.b32.xlu1 %v1129_v53, %s1966_s9 }
 0x103   : > { %1059 = vrot.lane.b32.xlu0 %v3857_v38, %s1965_s8 }
 0x104   : > { %v585_v26 = vpop.permute.xlu1 %584 }
 0x105   : > { %v2944_v34 = vsel %vm1261_vm3, %v1256_v56, %v585_v26  ;;  %v583_v6 = vpop.permute.xlu0 %582  ;;  %v3872_v26 = vld [vmem:[#allocation61_spill] sm:$0xff] }
 0x106   : > { %v2947_v37 = vsel %vm1261_vm3, %v1255_v21, %v583_v6  ;;  %889 = vrot.lane.b32.xlu1 %v3861_v55, %s1963_s6  ;;  %v3876_v6 = vld [vmem:[#allocation48_spill] sm:$0xff] }
 0x107   : > { %756 = vrot.lane.b32.xlu0 %v3862_v28, %s1962_s5 }
 0x108   : > { %v2953_v53 = vpop.permute.xlu1 %588 }
 0x109   : > { %v2955_v46 = vpop.permute.xlu0 %586 }
 0x10a   : > { %857 = vrot.lane.b32.xlu1 %v3863_v52, %s1963_s6 }
 0x10b   : > { %1160 = vrot.lane.b32.xlu0 %v3864_v13, %s1966_s9 }
 0x10c   : > { %v2961_v59 = vpop.permute.xlu1 %592 }
 0x10d   : > { %v2963_v60 = vpop.permute.xlu0 %590 }
 0x10e   : > { %955 = vrot.lane.b32.xlu1 %v2201_v62, %s1964_s7 }
 0x10f   : > { %987 = vrot.lane.b32.xlu0 %v2712_v50, %s1964_s7 }
 0x110   : > { %v2969_v32 = vpop.permute.xlu1 %630 }
 0x111   : > { %3865 = vst [vmem:[#allocation65_spill] sm:$0xff] %v2969_v32  ;;  %v2971_v16 = vpop.permute.xlu0 %628 }
 0x112   : > { %3866 = vst [vmem:[#allocation24_spill] sm:$0xff] %v2971_v16  ;;  %786 = vrot.lane.b32.xlu1 %v3867_v47, %s1962_s5 }
 0x113   : > { %1089 = vrot.lane.b32.xlu0 %v2746_v1, %s1965_s8 }
 0x114   : > { %v2977_v33 = vpop.permute.xlu1 %634 }
 0x115   : > { %3868 = vst [vmem:[#allocation66_spill] sm:$0xff] %v2977_v33  ;;  %v2979_v56 = vpop.permute.xlu0 %632 }
 0x116   : > { %3869 = vst [vmem:[#allocation27_spill] sm:$0xff] %v2979_v56  ;;  %1190 = vrot.lane.b32.xlu1 %v2768_v11, %s1966_s9 }
 0x117   : > { %1057 = vrot.lane.b32.xlu0 %v2236_v20, %s1965_s8 }
 0x118   : > { %v2985_v62 = vpop.permute.xlu1 %638 }
 0x119   : > { %3870 = vst [vmem:[#allocation67_spill] sm:$0xff] %v2985_v62  ;;  %v2987_v50 = vpop.permute.xlu0 %636 }
 0x11a   : > { %3871 = vst [vmem:[#allocation60_spill] sm:$0xff] %v2987_v50  ;;  %887 = vrot.lane.b32.xlu1 %v3872_v26, %s1963_s6 }
 0x11b   : > { %754 = vrot.lane.b32.xlu0 %v3873_v9, %s1962_s5 }
 0x11c   : > { %v2993_v1 = vpop.permute.xlu1 %642 }
 0x11d   : > { %3874 = vst [vmem:[#allocation19_spill] sm:$0xff] %v2993_v1  ;;  %v2995_v21 = vpop.permute.xlu0 %640  ;;  %v3899_v1 = vld [vmem:[#allocation43_spill] sm:$0xff] }
 0x11e   : > { %3875 = vst [vmem:[#allocation47_spill] sm:$0xff] %v2995_v21  ;;  %855 = vrot.lane.b32.xlu1 %v3876_v6, %s1963_s6  ;;  %v3896_v21 = vld [vmem:[#allocation56_spill] sm:$0xff] }
 0x11f   : > { %1158 = vrot.lane.b32.xlu0 %v2492_v10, %s1966_s9 }
 0x120   : > { %v3001_v20 = vpop.permute.xlu1 %646 }
 0x121   : > { %v3003_v11 = vpop.permute.xlu0 %644 }
 0x122   : > { %953 = vrot.lane.b32.xlu1 %v2207_v3, %s1964_s7 }
 0x123   : > { %985 = vrot.lane.b32.xlu0 %v2793_v39, %s1964_s7 }
 0x124   : > { %v3009_v61 = vpop.permute.xlu1 %650 }
 0x125   : > { %v3011_v16 = vpop.permute.xlu0 %648 }
 0x126   : > { %784 = vrot.lane.b32.xlu1 %v3877_v18, %s1962_s5 }
 0x127   : > { %1087 = vrot.lane.b32.xlu0 %v2829_v43, %s1965_s8 }
 0x128   : > { %v3017_v10 = vpop.permute.xlu1 %654 }
 0x129   : > { %v3019_v32 = vpop.permute.xlu0 %652 }
 0x12a   : > { %1188 = vrot.lane.b32.xlu1 %v2855_v48, %s1966_s9 }
 0x12b   : > { %1055 = vrot.lane.b32.xlu0 %v2241_v27, %s1965_s8 }
 0x12c   : > { %v3025_v3 = vpop.permute.xlu1 %658 }
 0x12d   : > { %v3027_v39 = vpop.permute.xlu0 %656 }
 0x12e   : > { %885 = vrot.lane.b32.xlu1 %v3878_v24, %s1963_s6 }
 0x12f   : > { %752 = vrot.lane.b32.xlu0 %v3879_v57, %s1962_s5 }
 0x130   : > { %v3033_v43 = vpop.permute.xlu1 %662 }
 0x131   : > { %3880 = vst [vmem:[#allocation34_spill] sm:$0xff] %v3033_v43  ;;  %v3035_v56 = vpop.permute.xlu0 %660 }
 0x132   : > { %3881 = vst [vmem:[#allocation61_spill] sm:$0xff] %v3035_v56  ;;  %853 = vrot.lane.b32.xlu1 %v3882_v5, %s1963_s6  ;;  %v3888_v56 = vld [vmem:[#allocation33_spill] sm:$0xff] }
 0x133   : > { %1156 = vrot.lane.b32.xlu0 %v2497_v63, %s1966_s9 }
 0x134   : > { %v3041_v27 = vpop.permute.xlu1 %666 }
 0x135   : > { %3883 = vst [vmem:[#allocation20_spill] sm:$0xff] %v3041_v27  ;;  %v3043_v48 = vpop.permute.xlu0 %664  ;;  %v3891_v27 = vld [vmem:[#allocation59_spill] sm:$0xff] }
 0x136   : > { %3884 = vst [vmem:[#allocation48_spill] sm:$0xff] %v3043_v48  ;;  %951 = vrot.lane.b32.xlu1 %v3885_v25, %s1964_s7 }
 0x137   : > { %983 = vrot.lane.b32.xlu0 %v2355_v49, %s1964_s7 }
 0x138   : > { %v3049_v33 = vpop.permute.xlu1 %670 }
 0x139   : > { %3886 = vst [vmem:[#allocation32_spill] sm:$0xff] %v3049_v33  ;;  %v3051_v43 = vpop.permute.xlu0 %668 }
 0x13a   : > { %3887 = vst [vmem:[#allocation58_spill] sm:$0xff] %v3051_v43  ;;  %782 = vrot.lane.b32.xlu1 %v3888_v56, %s1962_s5  ;;  %v3894_v43 = vld [vmem:[#allocation16_spill] sm:$0xff] }
 0x13b   : > { %1085 = vrot.lane.b32.xlu0 %v2381_v41, %s1965_s8 }
 0x13c   : > { %v3057_v63 = vpop.permute.xlu1 %674 }
 0x13d   : > { %3889 = vst [vmem:[#allocation17_spill] sm:$0xff] %v3057_v63  ;;  %v3059_v2 = vpop.permute.xlu0 %672 }
 0x13e   : > { %3890 = vst [vmem:[#allocation45_spill] sm:$0xff] %v3059_v2  ;;  %1186 = vrot.lane.b32.xlu1 %v3861_v55, %s1966_s9  ;;  %v3898_v2 = vld [vmem:[#allocation70_spill] sm:$0xff] }
 0x13f   : > { %1053 = vrot.lane.b32.xlu0 %v3862_v28, %s1965_s8 }
 0x140   : > { %v3065_v25 = vpop.permute.xlu1 %678 }
 0x141   : > { %v3067_v48 = vpop.permute.xlu0 %676 }
 0x142   : > { %883 = vrot.lane.b32.xlu1 %v3891_v27, %s1963_s6 }
 0x143   : > { %750 = vrot.lane.b32.xlu0 %v3892_v51, %s1962_s5 }
 0x144   : > { %v3073_v41 = vpop.permute.xlu1 %682 }
 0x145   : > { %v3075_v50 = vpop.permute.xlu0 %680 }
 0x146   : > { %851 = vrot.lane.b32.xlu1 %v3893_v23, %s1963_s6 }
 0x147   : > { %1154 = vrot.lane.b32.xlu0 %v3863_v52, %s1966_s9 }
 0x148   : > { %v3081_v55 = vpop.permute.xlu1 %686 }
 0x149   : > { %v3083_v28 = vpop.permute.xlu0 %684 }
 0x14a   : > { %949 = vrot.lane.b32.xlu1 %v3894_v43, %s1964_s7 }
 0x14b   : > { %981 = vrot.lane.b32.xlu0 %v2361_v8, %s1964_s7 }
 0x14c   : > { %v793_v14 = vpop.permute.xlu1 %792 }
 0x14d   : > { %v691_v62 = vpop.permute.xlu0 %690 }
 0x14e   : > { %780 = vrot.lane.b32.xlu1 %v3895_v15, %s1962_s5 }
 0x14f   : > { %1083 = vrot.lane.b32.xlu0 %v3867_v47, %s1965_s8  ;;  %v1260_v47 = vsel %vm1228_vm2, %v2355_v49, %v3898_v2 }
 0x150   : > { %v894_v33 = vpop.permute.xlu1 %893 }
 0x151   : > { %v761_v52 = vpop.permute.xlu0 %760 }
 0x152   : > { %1184 = vrot.lane.b32.xlu1 %v3872_v26, %s1966_s9  ;;  %v1293_v26 = vsel %vm1261_vm3, %v1260_v47, %v2961_v59  ;;  %v3114_v47 = vld [vmem:[%s2042_s28 + $0x98] sm:$0xff] }
 0x153   : > { %1051 = vrot.lane.b32.xlu0 %v3873_v9, %s1965_s8  ;;  %v1326_v9 = vsel %vm1294_vm4, %v1293_v26, %v691_v62 }
 0x154   : > { %v992_v43 = vpop.permute.xlu1 %991  ;;  %v1359_v49 = vsel %vm1327_vm5, %v1326_v9, %v793_v14 }
 0x155   : > { %v862_v0 = vpop.permute.xlu0 %861  ;;  %v1392_v59 = vsel %vm1360_vm6, %v1359_v49, %v894_v33  ;;  %v3900_v33 = vld [vmem:[#allocation31_spill] sm:$0xff] }
 0x156   : > { %881 = vrot.lane.b32.xlu1 %v3896_v21, %s1963_s6  ;;  %v1425_v62 = vsel %vm1393_vm7, %v1392_v59, %v992_v43  ;;  %v1877_v49 = vld [vmem:[%s2042_s28 + $0xb0] sm:$0xff] }
 0x157   : > { %748 = vrot.lane.b32.xlu0 %v3897_v19, %s1962_s5  ;;  %v1244_v63 = vsel %vm1228_vm2, %v1877_v49, %v3901_v29 }
 0x158   : > { %v960_v13 = vpop.permute.xlu1 %959  ;;  %v1277_v43 = vsel %vm1261_vm3, %v1244_v63, %v2845_v4 }
 0x159   : > { %v689_v31 = vpop.permute.xlu0 %688  ;;  %v1310_v59 = vsel %vm1294_vm4, %v1277_v43, %v3025_v3 }
 0x15a   : > { %849 = vrot.lane.b32.xlu1 %v3899_v1, %s1963_s6 }
 0x15b   : > { %1152 = vrot.lane.b32.xlu0 %v3876_v6, %s1966_s9 }
 0x15c   : > { %v791_v38 = vpop.permute.xlu1 %790 }
 0x15d   : > { %v1094_v2 = vpop.permute.xlu0 %1093 }
 0x15e   : > { %947 = vrot.lane.b32.xlu1 %v3114_v47, %s1964_s7  ;;  %v1458_v6 = vsel %vm1426_vm8, %v1425_v62, %v1094_v2 }
 0x15f   : > { %979 = vrot.lane.b32.xlu0 %v2333_v44, %s1964_s7 }
 0x160   : > { %v1195_v14 = vpop.permute.xlu1 %1194 }
 0x161   : > { %v1062_v26 = vpop.permute.xlu0 %1061  ;;  %v1491_v9 = vsel %vm1459_vm9, %v1458_v6, %v1195_v14  ;;  %v1343_v6 = vsel %vm1327_vm5, %v1310_v59, %v761_v52  ;;  %v3903_v52 = vld [vmem:[#allocation14_spill] sm:$0xff] }
 0x162   : > { %778 = vrot.lane.b32.xlu1 %v3900_v33, %s1962_s5  ;;  %1792 = vmatprep.subr.msk.mxu0 %vm1498_vm10, %v1491_v9  ;;  %v1376_v14 = vsel %vm1360_vm6, %v1343_v6, %v862_v0  ;;  %v3902_v9 = vld [vmem:[#allocation57_spill] sm:$0xff] }
 0x163   : > { %1081 = vrot.lane.b32.xlu0 %v3877_v18, %s1965_s8  ;;  %v1409_v18 = vsel %vm1393_vm7, %v1376_v14, %v960_v13 }
 0x164   : > { %v892_v2 = vpop.permute.xlu1 %891  ;;  %v1442_v4 = vsel %vm1426_vm8, %v1409_v18, %v1062_v26  ;;  %v3905_v26 = vld [vmem:[#allocation44_spill] sm:$0xff] }
 0x165   : > { %v759_v62 = vpop.permute.xlu0 %758 }
 0x166   : > { %1182 = vrot.lane.b32.xlu1 %v3878_v24, %s1966_s9 }
 0x167   : > { %1049 = vrot.lane.b32.xlu0 %v3879_v57, %s1965_s8  ;;  %v3904_v57 = vld [vmem:[#allocation71_spill] sm:$0xff] }
 0x168   : > { %v860_v29 = vpop.permute.xlu1 %859  ;;  %v1259_v13 = vsel %vm1228_vm2, %v2361_v8, %v3904_v57 }
 0x169   : > { %v1163_v63 = vpop.permute.xlu0 %1162  ;;  %v1292_v49 = vsel %vm1261_vm3, %v1259_v13, %v2963_v60 }
 0x16a   : > { %879 = vrot.lane.b32.xlu1 %v3902_v9, %s1963_s6  ;;  %v1475_v3 = vsel %vm1459_vm9, %v1442_v4, %v1163_v63  ;;  %v1325_v43 = vsel %vm1294_vm4, %v1292_v49, %v689_v31  ;;  %v1878_v4 = vld [vmem:[%s2042_s28 + $0x90] sm:$0xff] }
 0x16b   : > { %746 = vrot.lane.b32.xlu0 %v3903_v52, %s1962_s5  ;;  %1793 = vmatpush3.xpose.msk.msra.mxu0 %vm1498_vm10, %v1475_v3  ;;  %v1358_v6 = vsel %vm1327_vm5, %v1325_v43, %v791_v38  ;;  %v3906_v3 = vld [vmem:[#allocation28_spill] sm:$0xff]  ;;  %v1879_v38 = vld [vmem:[%s2042_s28 + $0xa8] sm:$0xff] }
 0x16c   : > { %v958_v0 = vpop.permute.xlu1 %957  ;;  %v1391_v18 = vsel %vm1360_vm6, %v1358_v6, %v892_v2  ;;  %v3907_v2 = vld [vmem:[#allocation64_spill] sm:$0xff] }
 0x16d   : > { %v990_v24 = vpop.permute.xlu0 %989  ;;  %v1243_v57 = vsel %vm1228_vm2, %v1879_v38, %v3907_v2 }
 0x16e   : > { %847 = vrot.lane.b32.xlu1 %v3905_v26, %s1963_s6  ;;  %v1424_v8 = vsel %vm1393_vm7, %v1391_v18, %v990_v24 }
 0x16f   : > { %1150 = vrot.lane.b32.xlu0 %v3882_v5, %s1966_s9 }
 0x170   : > { %v789_v59 = vpop.permute.xlu1 %788 }
 0x171   : > { %v1092_v14 = vpop.permute.xlu0 %1091 }
 0x172   : > { %945 = vrot.lane.b32.xlu1 %v1878_v4, %s1964_s7  ;;  %v1457_v60 = vsel %vm1426_vm8, %v1424_v8, %v1092_v14  ;;  %v3908_v4 = vld [vmem:[#allocation54_spill] sm:$0xff]  ;;  %v3911_v8 = vld [vmem:[#allocation41_spill] sm:$0xff] }
 0x173   : > { %977 = vrot.lane.b32.xlu0 %v2339_v17, %s1964_s7  ;;  %v1276_v17 = vsel %vm1261_vm3, %v1243_v57, %v2847_v30  ;;  %v1880_v57 = vld [vmem:[%s2042_s28 + $0x80] sm:$0xff] }
 0x174   : > { %v1193_v5 = vpop.permute.xlu1 %1192  ;;  %v1309_v13 = vsel %vm1294_vm4, %v1276_v17, %v3027_v39  ;;  %v1881_v17 = vld [vmem:[%s2042_s28 + $0x140] sm:$0xff] }
 0x175   : > { %v1490_v63 = vsel %vm1459_vm9, %v1457_v60, %v1193_v5  ;;  %v1060_v31 = vpop.permute.xlu0 %1059  ;;  %v1342_v43 = vsel %vm1327_vm5, %v1309_v13, %v759_v62  ;;  %v3909_v62 = vld [vmem:[#allocation11_spill] sm:$0xff] }
 0x176   : > { %776 = vrot.lane.b32.xlu1 %v3906_v3, %s1962_s5  ;;  %1794 = vmatprep.subr.msk.mxu0 %vm1498_vm10, %v1490_v63  ;;  %v1375_v6 = vsel %vm1360_vm6, %v1342_v43, %v860_v29  ;;  %v3910_v29 = vld [vmem:[#allocation68_spill] sm:$0xff]  ;;  %v3912_v43 = vld [vmem:[#allocation29_spill] sm:$0xff] }
 0x177   : > { %1079 = vrot.lane.b32.xlu0 %v3888_v56, %s1965_s8  ;;  %v1408_v56 = vsel %vm1393_vm7, %v1375_v6, %v958_v0  ;;  %v1258_v0 = vsel %vm1228_vm2, %v2333_v44, %v3910_v29 }
 0x178   : > { %v890_v24 = vpop.permute.xlu1 %889  ;;  %v1441_v30 = vsel %vm1426_vm8, %v1408_v56, %v1060_v31  ;;  %v1291_v60 = vsel %vm1261_vm3, %v1258_v0, %v2953_v53  ;;  %v3914_v0 = vld [vmem:[#allocation55_spill] sm:$0xff] }
 0x179   : > { %v757_v49 = vpop.permute.xlu0 %756  ;;  %v1324_v5 = vsel %vm1294_vm4, %v1291_v60, %v3081_v55 }
 0x17a   : > { %1180 = vrot.lane.b32.xlu1 %v3891_v27, %s1966_s9  ;;  %v1357_v31 = vsel %vm1327_vm5, %v1324_v5, %v789_v59  ;;  %v3913_v59 = vld [vmem:[#allocation62_spill] sm:$0xff] }
 0x17b   : > { %1047 = vrot.lane.b32.xlu0 %v3892_v51, %s1965_s8  ;;  %v1390_v2 = vsel %vm1360_vm6, %v1357_v31, %v890_v24  ;;  %v1242_v24 = vsel %vm1228_vm2, %v3114_v47, %v3913_v59  ;;  %v3917_v5 = vld [vmem:[#allocation42_spill] sm:$0xff]  ;;  %v3918_v59 = vld [vmem:[#allocation25_spill] sm:$0xff] }
 0x17c   : > { %v858_v14 = vpop.permute.xlu1 %857  ;;  %v1275_v6 = vsel %vm1261_vm3, %v1242_v24, %v2831_v40  ;;  %v1307_v24 = vsel %vm1294_vm4, %v2838_v45, %v3019_v32  ;;  %v3919_v32 = vld [vmem:[#allocation52_spill] sm:$0xff] }
 0x17d   : > { %v1161_v18 = vpop.permute.xlu0 %1160 }
 0x17e   : > { %v1474_v39 = vsel %vm1459_vm9, %v1441_v30, %v1161_v18  ;;  %877 = vrot.lane.b32.xlu1 %v3908_v4, %s1963_s6  ;;  %v1308_v30 = vsel %vm1294_vm4, %v1275_v6, %v3017_v10 }
 0x17f   : > { %744 = vrot.lane.b32.xlu0 %v3909_v62, %s1962_s5  ;;  %1795 = vmatpush3.xpose.msk.msra.mxu0 %vm1498_vm10, %v1474_v39  ;;  %v1341_v39 = vsel %vm1327_vm5, %v1308_v30, %v757_v49  ;;  %v3915_v49 = vld [vmem:[#allocation12_spill] sm:$0xff] }
 0x180   : > { %v956_v27 = vpop.permute.xlu1 %955 }
 0x181   : > { %v988_v51 = vpop.permute.xlu0 %987 }
 0x182   : > { %845 = vrot.lane.b32.xlu1 %v3911_v8, %s1963_s6  ;;  %v1423_v44 = vsel %vm1393_vm7, %v1390_v2, %v988_v51  ;;  %v1374_v51 = vsel %vm1360_vm6, %v1341_v39, %v858_v14  ;;  %v1882_v14 = vld [vmem:[%s2042_s28 + $0x150] sm:$0xff] }
 0x183   : > { %1148 = vrot.lane.b32.xlu0 %v3893_v23, %s1966_s9 }
 0x184   : > { %v787_v63 = vpop.permute.xlu1 %786 }
 0x185   : > { %v1090_v38 = vpop.permute.xlu0 %1089 }
 0x186   : > { %943 = vrot.lane.b32.xlu1 %v1880_v57, %s1964_s7  ;;  %v1456_v53 = vsel %vm1426_vm8, %v1423_v44, %v1090_v38 }
 0x187   : > { %975 = vrot.lane.b32.xlu0 %v1881_v17, %s1964_s7 }
 0x188   : > { %v1191_v23 = vpop.permute.xlu1 %1190 }
 0x189   : > { %v1489_v13 = vsel %vm1459_vm9, %v1456_v53, %v1191_v23  ;;  %v1058_v55 = vpop.permute.xlu0 %1057  ;;  %v1883_v53 = vld [vmem:[%s2042_s28 + $0x78] sm:$0xff] }
 0x18a   : > { %774 = vrot.lane.b32.xlu1 %v3912_v43, %s1962_s5  ;;  %1796 = vmatprep.subr.msk.mxu0 %vm1498_vm10, %v1489_v13  ;;  %v1884_v13 = vld [vmem:[%s2042_s28 + $0x138] sm:$0xff] }
 0x18b   : > { %1077 = vrot.lane.b32.xlu0 %v3895_v15, %s1965_s8  ;;  %v1407_v15 = vsel %vm1393_vm7, %v1374_v51, %v956_v27  ;;  %v3916_v27 = vld [vmem:[#allocation69_spill] sm:$0xff] }
 0x18c   : > { %v888_v56 = vpop.permute.xlu1 %887  ;;  %v1440_v40 = vsel %vm1426_vm8, %v1407_v15, %v1058_v55  ;;  %v1257_v60 = vsel %vm1228_vm2, %v1882_v14, %v3916_v27  ;;  %v1885_v14 = vld [vmem:[%s2042_s28 + $0x68] sm:$0xff] }
 0x18d   : > { %v755_v18 = vpop.permute.xlu0 %754  ;;  %v1290_v31 = vsel %vm1261_vm3, %v1257_v60, %v2955_v46  ;;  %v1886_v60 = vld [vmem:[%s2042_s28 + $0x128] sm:$0xff] }
 0x18e   : > { %1178 = vrot.lane.b32.xlu1 %v3896_v21, %s1966_s9  ;;  %v1323_v38 = vsel %vm1294_vm4, %v1290_v31, %v3083_v28 }
 0x18f   : > { %1045 = vrot.lane.b32.xlu0 %v3897_v19, %s1965_s8  ;;  %v1356_v57 = vsel %vm1327_vm5, %v1323_v38, %v787_v63 }
 0x190   : > { %v856_v47 = vpop.permute.xlu1 %855  ;;  %v1389_v17 = vsel %vm1360_vm6, %v1356_v57, %v888_v56  ;;  %v1340_v56 = vsel %vm1327_vm5, %v1307_v24, %v755_v18  ;;  %v1306_v57 = vsel %vm1294_vm4, %v2818_v36, %v3009_v61  ;;  %v3923_v61 = vld [vmem:[#allocation53_spill] sm:$0xff] }
 0x191   : > { %v1159_v29 = vpop.permute.xlu0 %1158  ;;  %v1373_v30 = vsel %vm1360_vm6, %v1340_v56, %v856_v47  ;;  %v3921_v47 = vld [vmem:[#allocation39_spill] sm:$0xff] }
 0x192   : > { %v1473_v10 = vsel %vm1459_vm9, %v1440_v40, %v1159_v29  ;;  %875 = vrot.lane.b32.xlu1 %v3914_v0, %s1963_s6  ;;  %v1322_v40 = vsel %vm1294_vm4, %v2944_v34, %v3073_v41  ;;  %v3922_v41 = vld [vmem:[#allocation26_spill] sm:$0xff] }
 0x193   : > { %742 = vrot.lane.b32.xlu0 %v3915_v49, %s1962_s5  ;;  %1797 = vmatpush3.xpose.msk.msra.mxu0 %vm1498_vm10, %v1473_v10 }
 0x194   : > { %v954_v21 = vpop.permute.xlu1 %953 }
 0x195   : > { %v986_v19 = vpop.permute.xlu0 %985  ;;  %v1406_v39 = vsel %vm1393_vm7, %v1373_v30, %v954_v21  ;;  %v1887_v30 = vld [vmem:[%s2042_s28 + $0x60] sm:$0xff] }
 0x196   : > { %843 = vrot.lane.b32.xlu1 %v3917_v5, %s1963_s6  ;;  %v1422_v23 = vsel %vm1393_vm7, %v1389_v17, %v986_v19 }
 0x197   : > { %1146 = vrot.lane.b32.xlu0 %v3899_v1, %s1966_s9 }
 0x198   : > { %v785_v2 = vpop.permute.xlu1 %784 }
 0x199   : > { %v1088_v44 = vpop.permute.xlu0 %1087  ;;  %v1355_v10 = vsel %vm1327_vm5, %v1322_v40, %v785_v2 }
 0x19a   : > { %941 = vrot.lane.b32.xlu1 %v1883_v53, %s1964_s7  ;;  %v1455_v46 = vsel %vm1426_vm8, %v1422_v23, %v1088_v44 }
 0x19b   : > { %973 = vrot.lane.b32.xlu0 %v1884_v13, %s1964_s7 }
 0x19c   : > { %v1189_v1 = vpop.permute.xlu1 %1188 }
 0x19d   : > { %v1488_v55 = vsel %vm1459_vm9, %v1455_v46, %v1189_v1  ;;  %v1056_v28 = vpop.permute.xlu0 %1055 }
 0x19e   : > { %772 = vrot.lane.b32.xlu1 %v3918_v59, %s1962_s5  ;;  %1798 = vmatprep.subr.msk.mxu0 %vm1498_vm10, %v1488_v55  ;;  %v3925_v55 = vld [vmem:[#allocation40_spill] sm:$0xff] }
 0x19f   : > { %1075 = vrot.lane.b32.xlu0 %v3900_v33, %s1965_s8  ;;  %v1439_v33 = vsel %vm1426_vm8, %v1406_v39, %v1056_v28  ;;  %v1321_v28 = vsel %vm1294_vm4, %v2947_v37, %v3075_v50  ;;  %v3926_v50 = vld [vmem:[#allocation22_spill] sm:$0xff] }
 0x1a0   : > { %v886_v63 = vpop.permute.xlu1 %885 }
 0x1a1   : > { %v753_v6 = vpop.permute.xlu0 %752  ;;  %v1388_v19 = vsel %vm1360_vm6, %v1355_v10, %v886_v63 }
 0x1a2   : > { %1176 = vrot.lane.b32.xlu1 %v3902_v9, %s1966_s9  ;;  %v3920_v9 = vld [vmem:[#allocation9_spill] sm:$0xff]  ;;  %v1339_v17 = vsel %vm1327_vm5, %v1306_v57, %v753_v6 }
 0x1a3   : > { %1043 = vrot.lane.b32.xlu0 %v3903_v52, %s1965_s8 }
 0x1a4   : > { %v854_v51 = vpop.permute.xlu1 %853 }
 0x1a5   : > { %v1157_v15 = vpop.permute.xlu0 %1156  ;;  %v1372_v53 = vsel %vm1360_vm6, %v1339_v17, %v854_v51  ;;  %v1888_v51 = vld [vmem:[%s2042_s28 + $0x120] sm:$0xff] }
 0x1a6   : > { %v1472_v45 = vsel %vm1459_vm9, %v1439_v33, %v1157_v15  ;;  %873 = vrot.lane.b32.xlu1 %v3919_v32, %s1963_s6 }
 0x1a7   : > { %740 = vrot.lane.b32.xlu0 %v3920_v9, %s1962_s5  ;;  %1799 = vmatpush3.xpose.msk.msra.mxu0 %vm1498_vm10, %v1472_v45 }
 0x1a8   : > { %v952_v18 = vpop.permute.xlu1 %951 }
 0x1a9   : > { %v984_v52 = vpop.permute.xlu0 %983  ;;  %v1405_v23 = vsel %vm1393_vm7, %v1372_v53, %v952_v18  ;;  %v1305_v18 = vsel %vm1294_vm4, %v2821_v54, %v3011_v16  ;;  %v3927_v16 = vld [vmem:[#allocation50_spill] sm:$0xff] }
 0x1aa   : > { %841 = vrot.lane.b32.xlu1 %v3921_v47, %s1963_s6  ;;  %v1421_v27 = vsel %vm1393_vm7, %v1388_v19, %v984_v52 }
 0x1ab   : > { %1144 = vrot.lane.b32.xlu0 %v3905_v26, %s1966_s9 }
 0x1ac   : > { %v783_v29 = vpop.permute.xlu1 %782 }
 0x1ad   : > { %v1086_v21 = vpop.permute.xlu0 %1085  ;;  %v1354_v24 = vsel %vm1327_vm5, %v1321_v28, %v783_v29 }
 0x1ae   : > { %939 = vrot.lane.b32.xlu1 %v1885_v14, %s1964_s7  ;;  %v1454_v26 = vsel %vm1426_vm8, %v1421_v27, %v1086_v21  ;;  %v3929_v27 = vld [vmem:[#allocation37_spill] sm:$0xff] }
 0x1af   : > { %971 = vrot.lane.b32.xlu0 %v1886_v60, %s1964_s7  ;;  %v1320_v60 = vsel %vm1294_vm4, %v2929_v22, %v3065_v25  ;;  %v3930_v25 = vld [vmem:[#allocation23_spill] sm:$0xff] }
 0x1b0   : > { %v1187_v31 = vpop.permute.xlu1 %1186 }
 0x1b1   : > { %v1487_v38 = vsel %vm1459_vm9, %v1454_v26, %v1187_v31  ;;  %v1054_v34 = vpop.permute.xlu0 %1053 }
 0x1b2   : > { %770 = vrot.lane.b32.xlu1 %v3922_v41, %s1962_s5  ;;  %1800 = vmatprep.subr.msk.mxu0 %vm1498_vm10, %v1487_v38 }
 0x1b3   : > { %1073 = vrot.lane.b32.xlu0 %v3906_v3, %s1965_s8  ;;  %v1438_v3 = vsel %vm1426_vm8, %v1405_v23, %v1054_v34 }
 0x1b4   : > { %v884_v2 = vpop.permute.xlu1 %883 }
 0x1b5   : > { %v751_v44 = vpop.permute.xlu0 %750  ;;  %v1387_v56 = vsel %vm1360_vm6, %v1354_v24, %v884_v2  ;;  %v1889_v2 = vld [vmem:[%s2042_s28 + $0x50] sm:$0xff]  ;;  %v3933_v24 = vld [vmem:[#allocation38_spill] sm:$0xff] }
 0x1b6   : > { %1174 = vrot.lane.b32.xlu1 %v3908_v4, %s1966_s9  ;;  %v3924_v4 = vld [vmem:[#allocation10_spill] sm:$0xff]  ;;  %v1338_v40 = vsel %vm1327_vm5, %v1305_v18, %v751_v44  ;;  %v1890_v44 = vld [vmem:[%s2042_s28 + $0x110] sm:$0xff]  ;;  %v1303_v18 = vsel %vm1294_vm4, %v2803_v12, %v3003_v11 }
 0x1b7   : > { %1041 = vrot.lane.b32.xlu0 %v3909_v62, %s1965_s8  ;;  %v3934_v11 = vld [vmem:[#allocation6_spill] sm:$0xff] }
 0x1b8   : > { %v852_v13 = vpop.permute.xlu1 %851 }
 0x1b9   : > { %v1155_v46 = vpop.permute.xlu0 %1154  ;;  %v1371_v29 = vsel %vm1360_vm6, %v1338_v40, %v852_v13  ;;  %v1304_v13 = vsel %vm1294_vm4, %v2799_v58, %v3001_v20  ;;  %v3931_v20 = vld [vmem:[#allocation51_spill] sm:$0xff] }
 0x1ba   : > { %v1471_v36 = vsel %vm1459_vm9, %v1438_v3, %v1155_v46  ;;  %871 = vrot.lane.b32.xlu1 %v3923_v61, %s1963_s6 }
 0x1bb   : > { %738 = vrot.lane.b32.xlu0 %v3924_v4, %s1962_s5  ;;  %1801 = vmatpush3.xpose.msk.msra.mxu0 %vm1498_vm10, %v1471_v36 }
 0x1bc   : > { %v950_v1 = vpop.permute.xlu1 %949 }
 0x1bd   : > { %v982_v62 = vpop.permute.xlu0 %981  ;;  %v1404_v10 = vsel %vm1393_vm7, %v1371_v29, %v950_v1 }
 0x1be   : > { %839 = vrot.lane.b32.xlu1 %v3925_v55, %s1963_s6  ;;  %v1420_v39 = vsel %vm1393_vm7, %v1387_v56, %v982_v62 }
 0x1bf   : > { %1142 = vrot.lane.b32.xlu0 %v3911_v8, %s1966_s9 }
 0x1c0   : > { %v781_v63 = vpop.permute.xlu1 %780 }
 0x1c1   : > { %v1084_v6 = vpop.permute.xlu0 %1083  ;;  %v1353_v31 = vsel %vm1327_vm5, %v1320_v60, %v781_v63 }
 0x1c2   : > { %937 = vrot.lane.b32.xlu1 %v1887_v30, %s1964_s7  ;;  %v1453_v8 = vsel %vm1426_vm8, %v1420_v39, %v1084_v6  ;;  %v1319_v6 = vsel %vm1294_vm4, %v2932_v35, %v3067_v48 }
 0x1c3   : > { %969 = vrot.lane.b32.xlu0 %v1888_v51, %s1964_s7 }
 0x1c4   : > { %v1185_v33 = vpop.permute.xlu1 %1184 }
 0x1c5   : > { %v1486_v15 = vsel %vm1459_vm9, %v1453_v8, %v1185_v33  ;;  %v1052_v37 = vpop.permute.xlu0 %1051  ;;  %v1891_v8 = vld [vmem:[%s2042_s28 + $0x48] sm:$0xff] }
 0x1c6   : > { %768 = vrot.lane.b32.xlu1 %v3926_v50, %s1962_s5  ;;  %1802 = vmatprep.subr.msk.mxu0 %vm1498_vm10, %v1486_v15  ;;  %v1892_v15 = vld [vmem:[%s2042_s28 + $0x108] sm:$0xff] }
 0x1c7   : > { %1071 = vrot.lane.b32.xlu0 %v3912_v43, %s1965_s8  ;;  %v1437_v43 = vsel %vm1426_vm8, %v1404_v10, %v1052_v37 }
 0x1c8   : > { %v882_v45 = vpop.permute.xlu1 %881 }
 0x1c9   : > { %v749_v52 = vpop.permute.xlu0 %748  ;;  %v1386_v34 = vsel %vm1360_vm6, %v1353_v31, %v882_v45  ;;  %v1893_v31 = vld [vmem:[%s2042_s28 + $0x38] sm:$0xff] }
 0x1ca   : > { %1172 = vrot.lane.b32.xlu1 %v3914_v0, %s1966_s9  ;;  %v3928_v0 = vld [vmem:[#allocation7_spill] sm:$0xff]  ;;  %v1337_v46 = vsel %vm1327_vm5, %v1304_v13, %v749_v52 }
 0x1cb   : > { %1039 = vrot.lane.b32.xlu0 %v3915_v49, %s1965_s8 }
 0x1cc   : > { %v850_v21 = vpop.permute.xlu1 %849 }
 0x1cd   : > { %v1153_v19 = vpop.permute.xlu0 %1152  ;;  %v1370_v36 = vsel %vm1360_vm6, %v1337_v46, %v850_v21 }
 0x1ce   : > { %v1470_v54 = vsel %vm1459_vm9, %v1437_v43, %v1153_v19  ;;  %869 = vrot.lane.b32.xlu1 %v3927_v16, %s1963_s6  ;;  %v3935_v43 = vld [vmem:[#allocation35_spill] sm:$0xff]  ;;  %v3936_v19 = vld [vmem:[#allocation17_spill] sm:$0xff] }
 0x1cf   : > { %736 = vrot.lane.b32.xlu0 %v3928_v0, %s1962_s5  ;;  %1803 = vmatpush3.xpose.msk.msra.mxu0 %vm1498_vm10, %v1470_v54  ;;  %v3937_v54 = vld [vmem:[#allocation86_spill] sm:$0xff] }
 0x1d0   : > { %v948_v14 = vpop.permute.xlu1 %947 }
 0x1d1   : > { %v980_v49 = vpop.permute.xlu0 %979  ;;  %v1403_v1 = vsel %vm1393_vm7, %v1370_v36, %v948_v14  ;;  %v1318_v14 = vsel %vm1294_vm4, %v3937_v54, %v3936_v19  ;;  %v3948_v19 = vld [vmem:[#allocation32_spill] sm:$0xff] }
 0x1d2   : > { %837 = vrot.lane.b32.xlu1 %v3929_v27, %s1963_s6  ;;  %v1419_v57 = vsel %vm1393_vm7, %v1386_v34, %v980_v49  ;;  %v1894_v34 = vld [vmem:[%s2042_s28 + $0xf8] sm:$0xff] }
 0x1d3   : > { %1140 = vrot.lane.b32.xlu0 %v3917_v5, %s1966_s9  ;;  %v3949_v54 = vld [vmem:[#allocation84_spill] sm:$0xff] }
 0x1d4   : > { %v779_v26 = vpop.permute.xlu1 %778 }
 0x1d5   : > { %v1082_v38 = vpop.permute.xlu0 %1081  ;;  %v1352_v30 = vsel %vm1327_vm5, %v1319_v6, %v779_v26  ;;  %v3945_v6 = vld [vmem:[#allocation87_spill] sm:$0xff] }
 0x1d6   : > { %935 = vrot.lane.b32.xlu1 %v1889_v2, %s1964_s7  ;;  %v1452_v5 = vsel %vm1426_vm8, %v1419_v57, %v1082_v38 }
 0x1d7   : > { %967 = vrot.lane.b32.xlu0 %v1890_v44, %s1964_s7 }
 0x1d8   : > { %v1183_v17 = vpop.permute.xlu1 %1182 }
 0x1d9   : > { %v1485_v53 = vsel %vm1459_vm9, %v1452_v5, %v1183_v17  ;;  %v1050_v22 = vpop.permute.xlu0 %1049  ;;  %v3938_v5 = vld [vmem:[#allocation21_spill] sm:$0xff] }
 0x1da   : > { %766 = vrot.lane.b32.xlu1 %v3930_v25, %s1962_s5  ;;  %1804 = vmatprep.subr.msk.mxu0 %vm1498_vm10, %v1485_v53  ;;  %v3939_v53 = vld [vmem:[#allocation19_spill] sm:$0xff] }
 0x1db   : > { %1069 = vrot.lane.b32.xlu0 %v3918_v59, %s1965_s8  ;;  %v1436_v59 = vsel %vm1426_vm8, %v1403_v1, %v1050_v22  ;;  %v3940_v22 = vld [vmem:[#allocation78_spill] sm:$0xff] }
 0x1dc   : > { %v880_v23 = vpop.permute.xlu1 %879 }
 0x1dd   : > { %v747_v3 = vpop.permute.xlu0 %746  ;;  %v1385_v51 = vsel %vm1360_vm6, %v1352_v30, %v880_v23  ;;  %v1302_v23 = vsel %vm1294_vm4, %v3940_v22, %v3939_v53 }
 0x1de   : > { %1170 = vrot.lane.b32.xlu1 %v3919_v32, %s1966_s9  ;;  %v3932_v32 = vld [vmem:[#allocation8_spill] sm:$0xff]  ;;  %v1336_v40 = vsel %vm1327_vm5, %v1303_v18, %v747_v3 }
 0x1df   : > { %1037 = vrot.lane.b32.xlu0 %v3920_v9, %s1965_s8 }
 0x1e0   : > { %v848_v62 = vpop.permute.xlu1 %847 }
 0x1e1   : > { %v1151_v28 = vpop.permute.xlu0 %1150  ;;  %v1369_v29 = vsel %vm1360_vm6, %v1336_v40, %v848_v62  ;;  %v3946_v40 = vld [vmem:[#allocation47_spill] sm:$0xff] }
 0x1e2   : > { %v1469_v58 = vsel %vm1459_vm9, %v1436_v59, %v1151_v28  ;;  %867 = vrot.lane.b32.xlu1 %v3931_v20, %s1963_s6  ;;  %v3941_v28 = vld [vmem:[#allocation49_spill] sm:$0xff] }
 0x1e3   : > { %734 = vrot.lane.b32.xlu0 %v3932_v32, %s1962_s5  ;;  %1805 = vmatpush3.xpose.msk.msra.mxu0 %vm1498_vm10, %v1469_v58  ;;  %v3942_v58 = vld [vmem:[#allocation5_spill] sm:$0xff] }
 0x1e4   : > { %v946_v63 = vpop.permute.xlu1 %945 }
 0x1e5   : > { %v978_v9 = vpop.permute.xlu0 %977 }
 0x1e6   : > { %835 = vrot.lane.b32.xlu1 %v3933_v24, %s1963_s6  ;;  %v1418_v33 = vsel %vm1393_vm7, %v1385_v51, %v978_v9  ;;  %v3944_v9 = vld [vmem:[#allocation45_spill] sm:$0xff] }
 0x1e7   : > { %1138 = vrot.lane.b32.xlu0 %v3921_v47, %s1966_s9 }
 0x1e8   : > { %v777_v56 = vpop.permute.xlu1 %776 }
 0x1e9   : > { %v1080_v39 = vpop.permute.xlu0 %1079 }
 0x1ea   : > { %933 = vrot.lane.b32.xlu1 %v1891_v8, %s1964_s7  ;;  %v1451_v47 = vsel %vm1426_vm8, %v1418_v33, %v1080_v39  ;;  %v3482_v39 = vld [vmem:[%s3661_s1] sm:$0xff] }
 0x1eb   : > { %965 = vrot.lane.b32.xlu0 %v1892_v15, %s1964_s7  ;;  %1824 = vmatprep.mubr.msk.f32.mxu0 %vm1498_vm10, %v3482_v39  ;;  %v1895_v15 = vld [vmem:[%s2042_s28 + $0x30] sm:$0xff] }
 0x1ec   : > { %v1181_v37 = vpop.permute.xlu1 %1180 }
 0x1ed   : > { %v1484_v45 = vsel %vm1459_vm9, %v1451_v47, %v1181_v37  ;;  %v1048_v35 = vpop.permute.xlu0 %1047  ;;  %v1896_v47 = vld [vmem:[%s2042_s28 + $0xf0] sm:$0xff] }
 0x1ee   : > { %764 = vrot.lane.b32.xlu1 %v2258_v42, %s1962_s5  ;;  %1806 = vmatprep.subr.msk.mxu0 %vm1498_vm10, %v1484_v45  ;;  %v1402_v42 = vsel %vm1393_vm7, %v1369_v29, %v946_v63  ;;  %v3943_v63 = vld [vmem:[#allocation36_spill] sm:$0xff]  ;;  %v3947_v29 = vld [vmem:[#allocation79_spill] sm:$0xff] }
 0x1ef   : > { %1067 = vrot.lane.b32.xlu0 %v3922_v41, %s1965_s8  ;;  %v1435_v41 = vsel %vm1426_vm8, %v1402_v42, %v1048_v35  ;;  %v1967_v35 = vmov 0   ;;  %v1301_v42 = vsel %vm1294_vm4, %v3947_v29, %v3946_v40 }
 0x1f0   : > { %v878_v48 = vpop.permute.xlu1 %877  ;;  %1875 = vset.pattern.permute.xlu0 %v1967_v35 }
 0x1f1   : > { %v745_v52 = vpop.permute.xlu0 %744 }
 0x1f2   : > { %1168 = vrot.lane.b32.xlu1 %v3923_v61, %s1966_s9  ;;  %v1335_v3 = vsel %vm1327_vm5, %v1302_v23, %v745_v52 }
 0x1f3   : > { %1035 = vrot.lane.b32.xlu0 %v3924_v4, %s1965_s8 }
 0x1f4   : > { %v846_v10 = vpop.permute.xlu1 %845 }
 0x1f5   : > { %v1149_v21 = vpop.permute.xlu0 %1148  ;;  %v1368_v46 = vsel %vm1360_vm6, %v1335_v3, %v846_v10 }
 0x1f6   : > { %v1468_v12 = vsel %vm1459_vm9, %v1435_v41, %v1149_v21  ;;  %865 = vrot.lane.b32.xlu1 %v2505_v7, %s1963_s6  ;;  %v1351_v7 = vsel %vm1327_vm5, %v1318_v14, %v777_v56  ;;  %v1317_v56 = vsel %vm1294_vm4, %v3945_v6, %v3944_v9 }
 0x1f7   : > { %732 = vrot.lane.b32.xlu0 %v3934_v11, %s1962_s5  ;;  %1807 = vmatpush3.xpose.msk.msra.mxu0 %vm1498_vm10, %v1468_v12  ;;  %v1384_v26 = vsel %vm1360_vm6, %v1351_v7, %v878_v48 }
 0x1f8   : > { %v944_v61 = vpop.permute.xlu1 %943 }
 0x1f9   : > { %v976_v4 = vpop.permute.xlu0 %975  ;;  %v1401_v36 = vsel %vm1393_vm7, %v1368_v46, %v944_v61 }
 0x1fa   : > { %833 = vrot.lane.b32.xlu1 %v3935_v43, %s1963_s6  ;;  %v1417_v38 = vsel %vm1393_vm7, %v1384_v26, %v976_v4 }
 0x1fb   : > { %1136 = vrot.lane.b32.xlu0 %v3925_v55, %s1966_s9 }
 0x1fc   : > { %v775_v49 = vpop.permute.xlu1 %774 }
 0x1fd   : > { %v1078_v60 = vpop.permute.xlu0 %1077  ;;  %v1350_v51 = vsel %vm1327_vm5, %v1317_v56, %v775_v49 }
 0x1fe   : > { %931 = vrot.lane.b32.xlu1 %v1893_v31, %s1964_s7  ;;  %v1450_v55 = vsel %vm1426_vm8, %v1417_v38, %v1078_v60 }
 0x1ff   : > { %963 = vrot.lane.b32.xlu0 %v1894_v34, %s1964_s7 }
 0x200   : > { %v1179_v2 = vpop.permute.xlu1 %1178 }
 0x201   : > { %v1483_v57 = vsel %vm1459_vm9, %v1450_v55, %v1179_v2  ;;  %v1046_v44 = vpop.permute.xlu0 %1045 }
 0x202   : > { %762 = vrot.lane.b32.xlu1 %v3938_v5, %s1962_s5  ;;  %1808 = vmatprep.subr.msk.mxu0 %vm1498_vm10, %v1483_v57  ;;  %v3950_v57 = vld [vmem:[#allocation67_spill] sm:$0xff] }
 0x203   : > { %1065 = vrot.lane.b32.xlu0 %v3926_v50, %s1965_s8  ;;  %v1434_v50 = vsel %vm1426_vm8, %v1401_v36, %v1046_v44  ;;  %v3951_v44 = vld [vmem:[#allocation76_spill] sm:$0xff] }
 0x204   : > { %v876_v17 = vpop.permute.xlu1 %875  ;;  %v1300_v5 = vsel %vm1294_vm4, %v3951_v44, %v3950_v57 }
 0x205   : > { %v743_v13 = vpop.permute.xlu0 %742  ;;  %v1383_v33 = vsel %vm1360_vm6, %v1350_v51, %v876_v17 }
 0x206   : > { %1166 = vrot.lane.b32.xlu1 %v3927_v16, %s1966_s9  ;;  %v1334_v41 = vsel %vm1327_vm5, %v1301_v42, %v743_v13 }
 0x207   : > { %1033 = vrot.lane.b32.xlu0 %v3928_v0, %s1965_s8 }
 0x208   : > { %v844_v1 = vpop.permute.xlu1 %843 }
 0x209   : > { %v1147_v62 = vpop.permute.xlu0 %1146  ;;  %v1367_v21 = vsel %vm1360_vm6, %v1334_v41, %v844_v1  ;;  %v3957_v41 = vld [vmem:[#allocation82_spill] sm:$0xff] }
 0x20a   : > { %v1467_v59 = vsel %vm1459_vm9, %v1434_v50, %v1147_v62  ;;  %863 = vrot.lane.b32.xlu1 %v3941_v28, %s1963_s6  ;;  %v3952_v62 = vld [vmem:[#allocation58_spill] sm:$0xff] }
 0x20b   : > { %730 = vrot.lane.b32.xlu0 %v3942_v58, %s1962_s5  ;;  %1809 = vmatpush3.xpose.msk.msra.mxu0 %vm1498_vm10, %v1467_v59  ;;  %v3953_v59 = vld [vmem:[#allocation85_spill] sm:$0xff]  ;;  %s1897_s5 = scalar_lea.vmem %s1689_s27, 256 }
 0x20c   : > { %v942_v16 = vpop.permute.xlu1 %941  ;;  %v1315_v28 = vsel %vm1294_vm4, %v3953_v59, %v3952_v62  ;;  %p1898_p11 = scmp.ne.s32.totalorder %s1689_s27, %s1897_s5 }
 0x20d   : > { %v974_v0 = vpop.permute.xlu0 %973 }
 0x20e   : > { %831 = vrot.lane.b32.xlu1 %v3943_v63, %s1963_s6  ;;  %p1899_p12 = pnand %p1898_p11, %p2027_p5  ;;  %s1968_s6 = smov [#allocation2]  }
 0x20f   : > { %1134 = vrot.lane.b32.xlu0 %v3929_v27, %s1966_s9  ;;  %v1416_v27 = vsel %vm1393_vm7, %v1383_v33, %v974_v0  ;;  %v3954_v33 = vld [vmem:[#allocation60_spill] sm:$0xff]  ;;  %s1901_s16 = sshll.u32 %s1968_s6, 4  ;;  %s1902_s16 = int_to_ptr.vmem [resolvable:$false] %s1901_s16 }
 0x210   : > { %v773_v30 = vpop.permute.xlu1 %772  ;;  %p1900_p13 = pneg %p1899_p12  ;;  %p1904_p0 = scmp.lt.s32.totalorder %s1689_s27, %s1902_s16 }
 0x211   : > { %v1076_v8 = vpop.permute.xlu0 %1075 }
 0x212   : > { %929 = vrot.lane.b32.xlu1 %v1895_v15, %s1964_s7  ;;  %v1449_v37 = vsel %vm1426_vm8, %v1416_v27, %v1076_v8  ;;  %v3955_v15 = vld [vmem:[#allocation77_spill] sm:$0xff] }
 0x213   : > { %961 = vrot.lane.b32.xlu0 %v1896_v47, %s1964_s7  ;;  %v1299_v27 = vsel %vm1294_vm4, %v3955_v15, %v3954_v33  ;;  %s1903_s7 = scalar_lea.vmem %s1902_s16, 512 }
 0x214   : > { %v1177_v45 = vpop.permute.xlu1 %1176  ;;  %p1905_p1 = scmp.lt.s32.totalorder %s1903_s7, %s1897_s5 }
 0x215   : > { %v1482_v48 = vsel %vm1459_vm9, %v1449_v37, %v1177_v45  ;;  %v1044_v18 = vpop.permute.xlu0 %1043 }
 0x216   : > { %1031 = vrot.lane.b32.xlu1 %v3932_v32, %s1965_s8  ;;  %1810 = vmatprep.subr.msk.mxu0 %vm1498_vm10, %v1482_v48  ;;  %v1400_v32 = vsel %vm1393_vm7, %v1367_v21, %v942_v16  ;;  %p1906_p2 = por %p1905_p1, %p1904_p0 }
 0x217   : > { %1063 = vrot.lane.b32.xlu0 %v3930_v25, %s1965_s8  ;;  %v1492_v25 = vld [vmem:[%s3662_s2] sm:$0xff]  ;;  %v1433_v11 = vsel %vm1426_vm8, %v1400_v32, %v1044_v18 }
 0x218   : > { %v874_v52 = vpop.permute.xlu1 %873  ;;  %p1907_p3 = pnand %p1906_p2, %p1900_p13 }
 0x219   : > { %v741_v10 = vpop.permute.xlu0 %740 }
 0x21a   : > { %1132 = vrot.lane.b32.xlu1 %v3933_v24, %s1966_s9  ;;  %v1333_v53 = vsel %vm1327_vm5, %v1300_v5, %v741_v10  ;;  %v3956_v10 = vld [vmem:[#allocation20_spill] sm:$0xff] }
 0x21b   : > { %1164 = vrot.lane.b32.xlu0 %v3931_v20, %s1966_s9  ;;  %v1316_v20 = vsel %vm1294_vm4, %v3949_v54, %v3948_v19  ;;  %v1314_v21 = vsel %vm1294_vm4, %v3957_v41, %v3956_v10  ;;  %v3960_v5 = vld [vmem:[#allocation48_spill] sm:$0xff] }
 0x21c   : > { %v842_v12 = vpop.permute.xlu1 %841  ;;  %v1349_v49 = vsel %vm1327_vm5, %v1316_v20, %v773_v30  ;;  %v3958_v20 = vld [vmem:[#allocation66_spill] sm:$0xff] }
 0x21d   : > { %v1145_v61 = vpop.permute.xlu0 %1144  ;;  %v1382_v60 = vsel %vm1360_vm6, %v1349_v49, %v874_v52  ;;  %v1366_v22 = vsel %vm1360_vm6, %v1333_v53, %v842_v12 }
 0x21e   : > { %v1466_v4 = vsel %vm1459_vm9, %v1433_v11, %v1145_v61 }
 0x21f   : > { %1811 = vmatpush3.xpose.msk.msra.mxu0 %vm1498_vm10, %v1466_v4  ;;  %1495 = vperm.xlu0 %1875, %v1492_v25  }
 0x220   : > { %v940_v24 = vpop.permute.xlu1 %939 }
 0x221   : > { %v972_v43 = vpop.permute.xlu0 %971  ;;  %v1399_v23 = vsel %vm1393_vm7, %v1366_v22, %v940_v24 }
 0x222   : > { %v1415_v26 = vsel %vm1393_vm7, %v1382_v60, %v972_v43 }
 0x224   : > { %v771_v14 = vpop.permute.xlu1 %770 }
 0x225   : > { %v1074_v7 = vpop.permute.xlu0 %1073  ;;  %v1348_v16 = vsel %vm1327_vm5, %v1315_v28, %v771_v14  ;;  %v3959_v14 = vld [vmem:[#allocation74_spill] sm:$0xff]  ;;  %v3962_v28 = vld [vmem:[#allocation27_spill] sm:$0xff] }
 0x226   : > { %v1448_v31 = vsel %vm1426_vm8, %v1415_v26, %v1074_v7  ;;  %v1298_v49 = vsel %vm1294_vm4, %v3959_v14, %v3958_v20 }
 0x228   : > { %v1175_v38 = vpop.permute.xlu1 %1174 }
 0x229   : > { %v1481_v34 = vsel %vm1459_vm9, %v1448_v31, %v1175_v38  ;;  %v1042_v55 = vpop.permute.xlu0 %1041 }
 0x22a   : > { %1812 = vmatprep.subr.msk.mxu0 %vm1498_vm10, %v1481_v34  ;;  %v1432_v3 = vsel %vm1426_vm8, %v1399_v23, %v1042_v55 }
 0x22c   : > { %v872_v2 = vpop.permute.xlu1 %871 }
 0x22d   : > { %v739_v17 = vpop.permute.xlu0 %738  ;;  %v1381_v63 = vsel %vm1360_vm6, %v1348_v16, %v872_v2 }
 0x22e   : > { %v1332_v37 = vsel %vm1327_vm5, %v1299_v27, %v739_v17  ;;  %v3961_v17 = vld [vmem:[#allocation83_spill] sm:$0xff]  ;;  %v3964_v27 = vld [vmem:[#allocation34_spill] sm:$0xff] }
 0x22f   : > { %v1313_v53 = vsel %vm1294_vm4, %v3961_v17, %v3960_v5 }
 0x230   : > { %v840_v13 = vpop.permute.xlu1 %839 }
 0x231   : > { %v1143_v46 = vpop.permute.xlu0 %1142  ;;  %v1365_v45 = vsel %vm1360_vm6, %v1332_v37, %v840_v13 }
 0x232   : > { %v1465_v36 = vsel %vm1459_vm9, %v1432_v3, %v1143_v46 }
 0x233   : > { %1813 = vmatpush3.xpose.msk.msra.mxu0 %vm1498_vm10, %v1465_v36 }
 0x234   : > { %v938_v1 = vpop.permute.xlu1 %937 }
 0x235   : > { %v970_v50 = vpop.permute.xlu0 %969  ;;  %v1398_v35 = vsel %vm1393_vm7, %v1365_v45, %v938_v1 }
 0x236   : > { %v1414_v9 = vsel %vm1393_vm7, %v1381_v63, %v970_v50 }
 0x238   : > { %v769_v58 = vpop.permute.xlu1 %768 }
 0x239   : > { %v1072_v0 = vpop.permute.xlu0 %1071  ;;  %v1347_v12 = vsel %vm1327_vm5, %v1314_v21, %v769_v58  ;;  %v3963_v58 = vld [vmem:[#allocation75_spill] sm:$0xff]  ;;  %v3966_v21 = vld [vmem:[#allocation65_spill] sm:$0xff] }
 0x23a   : > { %v1447_v6 = vsel %vm1426_vm8, %v1414_v9, %v1072_v0  ;;  %v1297_v16 = vsel %vm1294_vm4, %v3963_v58, %v3962_v28 }
 0x23c   : > { %v1173_v56 = vpop.permute.xlu1 %1172 }
 0x23d   : > { %v1480_v30 = vsel %vm1459_vm9, %v1447_v6, %v1173_v56  ;;  %v1040_v51 = vpop.permute.xlu0 %1039 }
 0x23e   : > { %1814 = vmatprep.subr.msk.mxu0 %vm1498_vm10, %v1480_v30  ;;  %v1431_v18 = vsel %vm1426_vm8, %v1398_v35, %v1040_v51 }
 0x240   : > { %v870_v8 = vpop.permute.xlu1 %869 }
 0x241   : > { %v737_v47 = vpop.permute.xlu0 %736  ;;  %v1380_v11 = vsel %vm1360_vm6, %v1347_v12, %v870_v8 }
 0x242   : > { %v1331_v60 = vsel %vm1327_vm5, %v1298_v49, %v737_v47  ;;  %v3965_v47 = vld [vmem:[#allocation80_spill] sm:$0xff] }
 0x243   : > { %v1312_v37 = vsel %vm1294_vm4, %v3965_v47, %v3964_v27  ;;  %v3968_v49 = vld [vmem:[#allocation24_spill] sm:$0xff] }
 0x244   : > { %v838_v48 = vpop.permute.xlu1 %837 }
 0x245   : > { %v1141_v52 = vpop.permute.xlu0 %1140  ;;  %v1364_v26 = vsel %vm1360_vm6, %v1331_v60, %v838_v48 }
 0x246   : > { %v1464_v40 = vsel %vm1459_vm9, %v1431_v18, %v1141_v52 }
 0x247   : > { %1815 = vmatpush3.xpose.msk.msra.mxu0 %vm1498_vm10, %v1464_v40 }
 0x248   : > { %v936_v29 = vpop.permute.xlu1 %935 }
 0x249   : > { %v968_v42 = vpop.permute.xlu0 %967  ;;  %v1397_v31 = vsel %vm1393_vm7, %v1364_v26, %v936_v29 }
 0x24a   : > { %v1413_v61 = vsel %vm1393_vm7, %v1380_v11, %v968_v42 }
 0x24c   : > { %v767_v32 = vpop.permute.xlu1 %766 }
 0x24d   : > { %v1070_v25 = vpop.permute.xlu0 %1069  ;;  %v1346_v23 = vsel %vm1327_vm5, %v1313_v53, %v767_v32  ;;  %v3967_v32 = vld [vmem:[#allocation72_spill] sm:$0xff] }
 0x24e   : > { %v1446_v4 = vsel %vm1426_vm8, %v1413_v61, %v1070_v25  ;;  %v1296_v12 = vsel %vm1294_vm4, %v3967_v32, %v3966_v21 }
 0x250   : > { %v1171_v24 = vpop.permute.xlu1 %1170 }
 0x251   : > { %v1479_v43 = vsel %vm1459_vm9, %v1446_v4, %v1171_v24  ;;  %v1038_v19 = vpop.permute.xlu0 %1037 }
 0x252   : > { %1816 = vmatprep.subr.msk.mxu0 %vm1498_vm10, %v1479_v43  ;;  %v1430_v34 = vsel %vm1426_vm8, %v1397_v31, %v1038_v19  ;;  %v3970_v31 = vld [vmem:[#allocation61_spill] sm:$0xff] }
 0x254   : > { %v868_v54 = vpop.permute.xlu1 %867 }
 0x255   : > { %v735_v7 = vpop.permute.xlu0 %734  ;;  %v1379_v3 = vsel %vm1360_vm6, %v1346_v23, %v868_v54 }
 0x256   : > { %v1330_v63 = vsel %vm1327_vm5, %v1297_v16, %v735_v7  ;;  %v3969_v7 = vld [vmem:[#allocation73_spill] sm:$0xff] }
 0x257   : > { %v1295_v60 = vsel %vm1294_vm4, %v3969_v7, %v3968_v49 }
 0x258   : > { %v836_v38 = vpop.permute.xlu1 %835 }
 0x259   : > { %v1139_v55 = vpop.permute.xlu0 %1138  ;;  %v1363_v9 = vsel %vm1360_vm6, %v1330_v63, %v836_v38  ;;  %v3971_v38 = vld [vmem:[#allocation81_spill] sm:$0xff] }
 0x25a   : > { %v1463_v2 = vsel %vm1459_vm9, %v1430_v34, %v1139_v55  ;;  %v1311_v34 = vsel %vm1294_vm4, %v3971_v38, %v3970_v31 }
 0x25b   : > { %1817 = vmatpush3.xpose.msk.msra.mxu0 %vm1498_vm10, %v1463_v2 }
 0x25c   : > { %v934_v57 = vpop.permute.xlu1 %933 }
 0x25d   : > { %v966_v44 = vpop.permute.xlu0 %965  ;;  %v1396_v6 = vsel %vm1393_vm7, %v1363_v9, %v934_v57 }
 0x25e   : > { %v1412_v46 = vsel %vm1393_vm7, %v1379_v3, %v966_v44 }
 0x260   : > { %v765_v22 = vpop.permute.xlu1 %764 }
 0x261   : > { %v1068_v13 = vpop.permute.xlu0 %1067  ;;  %v1345_v35 = vsel %vm1327_vm5, %v1312_v37, %v765_v22 }
 0x262   : > { %v1445_v36 = vsel %vm1426_vm8, %v1412_v46, %v1068_v13 }
 0x264   : > { %v1169_v1 = vpop.permute.xlu1 %1168 }
 0x265   : > { %v1478_v50 = vsel %vm1459_vm9, %v1445_v36, %v1169_v1  ;;  %v1036_v62 = vpop.permute.xlu0 %1035 }
 0x266   : > { %1818 = vmatprep.subr.msk.mxu0 %vm1498_vm10, %v1478_v50  ;;  %v1429_v30 = vsel %vm1426_vm8, %v1396_v6, %v1036_v62 }
 0x268   : > { %v866_v59 = vpop.permute.xlu1 %865 }
 0x269   : > { %v733_v0 = vpop.permute.xlu0 %732  ;;  %v1378_v18 = vsel %vm1360_vm6, %v1345_v35, %v866_v59 }
 0x26a   : > { %v1329_v11 = vsel %vm1327_vm5, %v1296_v12, %v733_v0 }
 0x26c   : > { %v834_v56 = vpop.permute.xlu1 %833 }
 0x26d   : > { %v1137_v51 = vpop.permute.xlu0 %1136  ;;  %v1362_v61 = vsel %vm1360_vm6, %v1329_v11, %v834_v56 }
 0x26e   : > { %v1462_v8 = vsel %vm1459_vm9, %v1429_v30, %v1137_v51 }
 0x26f   : > { %1819 = vmatpush3.xpose.msk.msra.mxu0 %vm1498_vm10, %v1462_v8 }
 0x270   : > { %v932_v33 = vpop.permute.xlu1 %931 }
 0x271   : > { %v964_v15 = vpop.permute.xlu0 %963  ;;  %v1395_v4 = vsel %vm1393_vm7, %v1362_v61, %v932_v33 }
 0x272   : > { %v1411_v52 = vsel %vm1393_vm7, %v1378_v18, %v964_v15 }
 0x274   : > { %v763_v45 = vpop.permute.xlu1 %762 }
 0x275   : > { %v1066_v48 = vpop.permute.xlu0 %1065  ;;  %v1344_v57 = vsel %vm1327_vm5, %v1311_v34, %v763_v45 }
 0x276   : > { %v1444_v40 = vsel %vm1426_vm8, %v1411_v52, %v1066_v48 }
 0x278   : > { %v1167_v29 = vpop.permute.xlu1 %1166 }
 0x279   : > { %v1477_v42 = vsel %vm1459_vm9, %v1444_v40, %v1167_v29  ;;  %v1034_v10 = vpop.permute.xlu0 %1033 }
 0x27a   : > { %1820 = vmatprep.subr.msk.mxu0 %vm1498_vm10, %v1477_v42  ;;  %v1428_v43 = vsel %vm1426_vm8, %v1395_v4, %v1034_v10 }
 0x27c   : > { %v864_v41 = vpop.permute.xlu1 %863 }
 0x27d   : > { %v731_v25 = vpop.permute.xlu0 %730  ;;  %v1377_v5 = vsel %vm1360_vm6, %v1344_v57, %v864_v41 }
 0x27e   : > { %v1328_v55 = vsel %vm1327_vm5, %v1295_v60, %v731_v25 }
 0x280   : > { %v832_v24 = vpop.permute.xlu1 %831 }
 0x281   : > { %v1135_v19 = vpop.permute.xlu0 %1134  ;;  %v1361_v44 = vsel %vm1360_vm6, %v1328_v55, %v832_v24 }
 0x282   : > { %v1461_v54 = vsel %vm1459_vm9, %v1428_v43, %v1135_v19 }
 0x283   : > { %1821 = vmatpush3.xpose.msk.msra.mxu0 %vm1498_vm10, %v1461_v54 }
 0x284   : > { %v930_v20 = vpop.permute.xlu1 %929 }
 0x285   : > { %v962_v14 = vpop.permute.xlu0 %961  ;;  %v1394_v17 = vsel %vm1393_vm7, %v1361_v44, %v930_v20 }
 0x286   : > { %v1410_v53 = vsel %vm1393_vm7, %v1377_v5, %v962_v14 }
 0x288   : > { %v1032_v26 = vpop.permute.xlu1 %1031 }
 0x289   : > { %v1064_v2 = vpop.permute.xlu0 %1063  ;;  %v1427_v22 = vsel %vm1426_vm8, %v1394_v17, %v1032_v26 }
 0x28a   : > { %v1443_v13 = vsel %vm1426_vm8, %v1410_v53, %v1064_v2 }
 0x28c   : > { %v1133_v23 = vpop.permute.xlu1 %1132 }
 0x28d   : > { %v1460_v3 = vsel %vm1459_vm9, %v1427_v22, %v1133_v23  ;;  %v1165_v46 = vpop.permute.xlu0 %1164 }
 0x28e   : > { %v1476_v36 = vsel %vm1459_vm9, %v1443_v13, %v1165_v46 }
 0x28f   : > { %1822 = vmatprep.subr.msk.mxu0 %vm1498_vm10, %v1476_v36 }
 0x290   : > { %1823 = vmatpush3.xpose.msk.msra.mxu0 %vm1498_vm10, %v1460_v3 }
 0x293   : > { %1825 = vmatmul.mubr.msk.f32.vlgmr.msra.gmra.mxu0 %vm1498_vm10, %v3482_v39 }
 0x29a   : > { %v1496_v1 = vpop.permute.xlu0 %1495 }
 0x353   : > { %v1664_v50 = vpop.f32.mrf.mxu0 }
 0x354   : > { %v1665_v62 = vadd.f32 %v1664_v50, %v1496_v1 }
 0x355   : > { %v1666_v59 = vpop.f32.mrf.mxu0 }
 0x356   : > { %v1669_v28 = vmax.f32 %v1665_v62, 0.0  ;;  %v1667_v58 = vadd.f32 %v1666_v59, %v1496_v1 }
 0x358   : > { %1671 = vst [vmem:[%s163_s26] sm:$0xff] %v1669_v28  ;;  %v1670_v16 = vmax.f32 %v1667_v58, 0.0 }
 0x35a   : > { %1672 = vst [vmem:[%s163_s26 + $0x8] sm:$0xff] %v1670_v16 }
 0x35b   : > { %1910 = shalt.err (!%p1907_p3)
}
 0x35c   : > { %s1911_s8 = scalar_lea.hbm %s1686_s30, 256  ;;  %s1915_s11 = scalar_lea.hbm %s3663_s3, 512 }
 0x35d   : > { %p1912_p4 = scmp.ne.s32.totalorder %s1686_s30, %s1911_s8  ;;  %p1916_p9 = scmp.lt.s32.totalorder %s1686_s30, %s3663_s3 }
 0x35e   : > { %p1917_p10 = scmp.lt.s32.totalorder %s1915_s11, %s1911_s8 }
 0x35f   : > { %p1913_p7 = pnand %p1912_p4, %p2027_p5 }
 0x360   : > { %p1918_p11 = por %p1917_p10, %p1916_p9 }
 0x361   : > { %p1914_p8 = pneg %p1913_p7 }
 0x363   : > { %p1919_p12 = pnand %p1918_p11, %p1914_p8 }
 0x365   : > { %1922 = shalt.err (!%p1919_p12)
}
 0x366   : > { %1827 = dma.vmem_to_hbm [thread:$0]  (%p2027_p5), %s1689_s27, 256, %s1686_s30, %s1674_s4  }
 0x367 PF: > { %p1833_p13 = scmp.ge.s32.totalorder %s1957_s15, 2  ;;  %s1700_s20 = sand.u32 1, %s1945_s12  }
 0x368   : > { %s1701_s24 = scalar_lea.sflag [#allocation3], %s1700_s20 }
 0x369   : > { %p1830_p0 = pnand %p1833_p13, %p2031_p6 }
 0x36b   : > { %p1831_p1 = pneg %p1830_p0 }
 0x36d   : > { %1940 = dma.done.wait (%p1831_p1), %s1701_s24, 256  }
 0x36e   : > { %1942 = vsyncadd (%p1831_p1), %s1701_s24, 4294967040  ;;  %p13_p2 = scmp.ge.s32.totalorder %s2014_s18, 4   ;;  %s3972_s12 = smov %s1949_s13 }
 0x36f   : > { %s3973_s13 = smov %s1953_s14  ;;  %s3974_s14 = smov %s2025_s21 }
 0x370   : > { %s3975_s15 = smov %s2014_s18  ;;  %15 = sbr.rel (!%p13_p2) target bundleno = 3 (0x3), region = 67 }
 0x375   :  { %1706 = vsyncpa [#allocation3], 1 }
 0x376   :  { %1708 = vsyncpa [#allocation3 + $0x1], 1 }

</bundles_post_ra>
